<compile_context>
chip_gen: v5e
topology: v5e:2x2
jax: 0.10.0
libtpu: 0.0.40
codegen_flags: <defaults>
</compile_context>

<pallas_src>
import jax
import jax.numpy as jnp
from jax import lax
from jax.experimental import pallas as pl
from jax.experimental.pallas import tpu as pltpu

_BN_EPS = 1e-5
_VMEM_LIMIT = 32 * 1024 * 1024


# ---------------------------------------------------------------------------
# Kernels
# ---------------------------------------------------------------------------

def _make_dual_conv_kernel(H, W, Cin, c_pass, c_next):
    """Fused pair of 3x3 convs sharing one input (pre-padded, bf16).

    Produces:
      op_ref : (1, H*W, c_pass) f32   -- activated "passthrough" branch
               (conv3X3 or conv5X5_2 group; final-ReLU already applied)
      on_ref : (1, H+2, W+2, c_next) bf16 -- activated "next" branch
               (conv5X5_1 or conv7X7_2 group; leaky applied), written with a
               zero halo so the consumer needs no wrapper-side jnp.pad.
    """
    Cout = c_pass + c_next
    K = 3 * Cin

    def kernel(x_ref, w_ref, b_ref, s_ref, op_ref, on_ref):
        x = x_ref[0]                                        # (H+2, W+2, Cin) bf16
        # im2col along kw: one lane-axis concat instead of 9 strided reshapes.
        xcol = jnp.concatenate([x[:, kw:kw + W, :] for kw in range(3)],
                               axis=-1)                     # (H+2, W, 3*Cin)
        # accumulator initialized with the folded-BN bias (f32)
        acc = jnp.broadcast_to(b_ref[...], (H * W, Cout))
        for kh in range(3):
            patch = xcol[kh:kh + H].reshape(H * W, K)       # major-dim merge
            acc = acc + jnp.dot(patch, w_ref[kh],
                                preferred_element_type=jnp.float32)
        # per-channel slope: 0.0 -> ReLU, leaky -> LeakyReLU
        y = jnp.where(acc >= 0.0, acc, acc * s_ref[...])
        # passthrough group: lane-dense f32 slab, no reshape before the store
        op_ref[0] = y[:, :c_pass]
        # next group: bf16, spatially padded with a zero halo (one dense store)
        y2 = y[:, c_pass:].astype(jnp.bfloat16).reshape(H, W, c_next)
        zr = jnp.zeros((1, W, c_next), jnp.bfloat16)
        zc = jnp.zeros((H + 2, 1, c_next), jnp.bfloat16)
        yp = jnp.concatenate([zr, y2, zr], axis=0)          # (H+2, W, c_next)
        on_ref[0] = jnp.concatenate([zc, yp, zc], axis=1)   # (H+2, W+2, c_next)

    return kernel


def _make_final_conv_kernel(H, W, Cin, Cout):
    """conv7x7_3 + final ReLU on the pre-padded bf16 c7_2; writes only c7."""
    K = 3 * Cin

    def kernel(x_ref, w_ref, b_ref, o_ref):
        x = x_ref[0]                                        # (H+2, W+2, Cin) bf16
        xcol = jnp.concatenate([x[:, kw:kw + W, :] for kw in range(3)],
                               axis=-1)                     # (H+2, W, 3*Cin)
        acc = jnp.broadcast_to(b_ref[...], (H * W, Cout))
        for kh in range(3):
            acc = acc + jnp.dot(xcol[kh:kh + H].reshape(H * W, K), w_ref[kh],
                                preferred_element_type=jnp.float32)
        o_ref[0] = jnp.maximum(acc, 0.0)                    # final F.relu

    return kernel


# ---------------------------------------------------------------------------
# pallas_call wrappers
# ---------------------------------------------------------------------------

def _dual_conv(xp_bf16, w3, bias, slope, c_pass, c_next):
    """xp: (N, H+2, W+2, Cin) bf16, zero halo; w3: (3, 3*Cin, Cout) bf16."""
    N, Hp, Wp, Cin = xp_bf16.shape
    H, W = Hp - 2, Wp - 2
    Cout = c_pass + c_next
    return pl.pallas_call(
        _make_dual_conv_kernel(H, W, Cin, c_pass, c_next),
        out_shape=(
            jax.ShapeDtypeStruct((N, H * W, c_pass), jnp.float32),
            jax.ShapeDtypeStruct((N, Hp, Wp, c_next), jnp.bfloat16),
        ),
        grid=(N,),
        in_specs=[
            pl.BlockSpec((1, Hp, Wp, Cin), lambda n: (n, 0, 0, 0)),
            pl.BlockSpec((3, 3 * Cin, Cout), lambda n: (0, 0, 0)),
            pl.BlockSpec((1, Cout), lambda n: (0, 0)),
            pl.BlockSpec((1, Cout), lambda n: (0, 0)),
        ],
        out_specs=(
            pl.BlockSpec((1, H * W, c_pass), lambda n: (n, 0, 0)),
            pl.BlockSpec((1, Hp, Wp, c_next), lambda n: (n, 0, 0, 0)),
        ),
        compiler_params=pltpu.CompilerParams(
            dimension_semantics=("parallel",),
            vmem_limit_bytes=_VMEM_LIMIT),
    )(xp_bf16, w3, bias, slope)


def _final_conv(xp_bf16, w3, bias, Cout):
    N, Hp, Wp, Cin = xp_bf16.shape
    H, W = Hp - 2, Wp - 2
    return pl.pallas_call(
        _make_final_conv_kernel(H, W, Cin, Cout),
        out_shape=jax.ShapeDtypeStruct((N, H * W, Cout), jnp.float32),
        grid=(N,),
        in_specs=[
            pl.BlockSpec((1, Hp, Wp, Cin), lambda n: (n, 0, 0, 0)),
            pl.BlockSpec((3, 3 * Cin, Cout), lambda n: (0, 0, 0)),
            pl.BlockSpec((1, Cout), lambda n: (0, 0)),
        ],
        out_specs=pl.BlockSpec((1, H * W, Cout), lambda n: (n, 0, 0)),
        compiler_params=pltpu.CompilerParams(
            dimension_semantics=("parallel",),
            vmem_limit_bytes=_VMEM_LIMIT),
    )(xp_bf16, w3, bias)


# ---------------------------------------------------------------------------
# parameter construction (deterministic, synthetic) and BN/branch fusion
# ---------------------------------------------------------------------------

def _fold_bn(gamma, beta, mean, var):
    scale = gamma / jnp.sqrt(var + _BN_EPS)
    bias = beta - mean * scale
    return scale, bias


def _make_conv_bn_params(key, cin, cout):
    kw, kg, kb, km, kv = jax.random.split(key, 5)
    # conv weight in PyTorch layout (Cout, Cin, 3, 3) -> HWIO
    w_oihw = jax.random.normal(kw, (cout, cin, 3, 3), jnp.float32) * 0.1
    w_hwio = jnp.transpose(w_oihw, (2, 3, 1, 0))
    gamma = 1.0 + 0.1 * jax.random.normal(kg, (cout,), jnp.float32)
    beta = 0.1 * jax.random.normal(kb, (cout,), jnp.float32)
    mean = 0.1 * jax.random.normal(km, (cout,), jnp.float32)
    var = jnp.abs(jax.random.normal(kv, (cout,), jnp.float32)) + 0.5
    scale, bias = _fold_bn(gamma, beta, mean, var)
    return {"w": w_hwio, "scale": scale, "bias": bias}


def init_ssh_params(key, in_channel, out_channel):
    assert out_channel % 4 == 0
    keys = jax.random.split(key, 5)
    return {
        "conv3X3":   _make_conv_bn_params(keys[0], in_channel, out_channel // 2),
        "conv5X5_1": _make_conv_bn_params(keys[1], in_channel, out_channel // 4),
        "conv5X5_2": _make_conv_bn_params(keys[2], out_channel // 4, out_channel // 4),
        "conv7X7_2": _make_conv_bn_params(keys[3], out_channel // 4, out_channel // 4),
        "conv7x7_3": _make_conv_bn_params(keys[4], out_channel // 4, out_channel // 4),
    }


def prepare_fused_params(params, out_channel):
    """Fold BN scale into weights, fuse shared-input branches, pre-reshape for
    the im2col matmul (3, 3*Cin, Cout), cast weights to bf16."""
    oc2, oc4 = out_channel // 2, out_channel // 4
    leaky = 0.1 if out_channel <= 64 else 0.0   # must stay in sync with torch cfg

    def folded(p):
        w = p["w"] * p["scale"][None, None, None, :]        # (3,3,Cin,Cout), BN folded
        _, _, cin, cout = w.shape
        # rows ordered [kw=0 | kw=1 | kw=2] x Cin — matches the in-kernel im2col
        w3 = w.reshape(3, 3 * cin, cout)
        return w3, p["bias"].reshape(1, cout).astype(jnp.float32)

    w3, b3 = folded(params["conv3X3"])
    w51, b51 = folded(params["conv5X5_1"])
    w52, b52 = folded(params["conv5X5_2"])
    w72, b72 = folded(params["conv7X7_2"])
    w73, b73 = folded(params["conv7x7_3"])

    zeros2 = jnp.zeros((1, oc2), jnp.float32)
    zeros4 = jnp.zeros((1, oc4), jnp.float32)
    lk4 = jnp.full((1, oc4), leaky, jnp.float32)

    return {
        # call A on x: [conv3X3 (ReLU from final F.relu) | conv5X5_1 (leaky)]
        "a": {"w": jnp.concatenate([w3, w51], axis=-1).astype(jnp.bfloat16),
              "b": jnp.concatenate([b3, b51], axis=-1),
              "s": jnp.concatenate([zeros2, lk4], axis=-1)},
        # call B on c5_1: [conv5X5_2 (ReLU) | conv7X7_2 (leaky)]
        "b": {"w": jnp.concatenate([w52, w72], axis=-1).astype(jnp.bfloat16),
              "b": jnp.concatenate([b52, b72], axis=-1),
              "s": jnp.concatenate([zeros4, lk4], axis=-1)},
        # call C on c7_2: conv7x7_3 (ReLU)
        "c": {"w": w73.astype(jnp.bfloat16), "b": b73},
    }


# ---------------------------------------------------------------------------
# SSH forward
# ---------------------------------------------------------------------------

def ssh_forward(fused, x_nchw, out_channel):
    oc2, oc4 = out_channel // 2, out_channel // 4
    N, _, H, W = x_nchw.shape
    # NCHW -> NHWC, cast once to bf16, pad the external input once.
    x = jnp.transpose(x_nchw, (0, 2, 3, 1)).astype(jnp.bfloat16)
    xp = jnp.pad(x, ((0, 0), (1, 1), (1, 1), (0, 0)))
    # call A: conv3X3 + conv5X5_1 (emits c3 slab + pre-padded bf16 c5_1)
    c3, c51_pad = _dual_conv(xp, fused["a"]["w"], fused["a"]["b"],
                             fused["a"]["s"], oc2, oc4)
    # call B: conv5X5_2 + conv7X7_2 (emits c5 slab + pre-padded bf16 c7_2)
    c5, c72_pad = _dual_conv(c51_pad, fused["b"]["w"], fused["b"]["b"],
                             fused["b"]["s"], oc4, oc4)
    # call C: conv7x7_3 + ReLU (c7 slab only)
    c7 = _final_conv(c72_pad, fused["c"]["w"], fused["c"]["b"], oc4)
    # single XLA concat + reshape + transpose (fuses)
    out = jnp.concatenate([c3, c5, c7], axis=-1).reshape(N, H, W, out_channel)
    return jnp.transpose(out, (0, 3, 1, 2))                  # NHWC -> NCHW


# ---------------------------------------------------------------------------
# pure-JAX reference (same bf16 operand quantization as the kernels)
# ---------------------------------------------------------------------------

def _ref_conv(x_f32, w3_bf16, bias, slope_vec):
    _, k3, cout = w3_bf16.shape
    cin = k3 // 3
    w = w3_bf16.astype(jnp.float32).reshape(3, 3, cin, cout)
    y = lax.conv_general_dilated(
        x_f32, w, window_strides=(1, 1), padding="SAME",
        dimension_numbers=("NHWC", "HWIO", "NHWC"))
    y = y + bias
    return jnp.where(y >= 0.0, y, y * slope_vec)


def ssh_reference(fused, x_nchw, out_channel):
    oc2, oc4 = out_channel // 2, out_channel // 4
    x = jnp.transpose(x_nchw, (0, 2, 3, 1))
    xq = x.astype(jnp.bfloat16).astype(jnp.float32)
    ya = _ref_conv(xq, fused["a"]["w"], fused["a"]["b"], fused["a"]["s"])
    c3 = ya[..., :oc2]
    c51 = ya[..., oc2:].astype(jnp.bfloat16).astype(jnp.float32)
    yb = _ref_conv(c51, fused["b"]["w"], fused["b"]["b"], fused["b"]["s"])
    c5 = yb[..., :oc4]
    c72 = yb[..., oc4:].astype(jnp.bfloat16).astype(jnp.float32)
    c7 = _ref_conv(c72, fused["c"]["w"], fused["c"]["b"],
                   jnp.zeros((1, oc4), jnp.float32))
    out = jnp.concatenate([c3, c5, c7], axis=-1)
    return jnp.transpose(out, (0, 3, 1, 2))


if __name__ == "__main__":
    key = jax.random.PRNGKey(0)
    k_param, k_input = jax.random.split(key)

    N, IN_CH, OUT_CH, H, W = 2, 8, 16, 16, 16

    raw_params = init_ssh_params(k_param, IN_CH, OUT_CH)
    fused_params = prepare_fused_params(raw_params, OUT_CH)
    x = jax.random.normal(k_input, (N, IN_CH, H, W), jnp.float32)  # NCHW input

    out = jax.block_until_ready(ssh_forward(fused_params, x, OUT_CH))
    ref = jax.block_until_ready(ssh_reference(fused_params, x, OUT_CH))

    assert out.shape == (N, OUT_CH, H, W), out.shape
    # tolerance accounts for bf16 operands / accumulation-order differences
    assert jnp.allclose(out, ref, atol=1e-2, rtol=1e-2), (
        float(jnp.max(jnp.abs(out - ref))))

    print("KERNEL_OK")
</pallas_src>

<mosaic_0001>
module attributes {stable_mosaic.version = 11 : i64} {
  func.func @kernel(%arg0: i32, %arg1: memref<1x18x18x8xbf16, #tpu.memory_space<vmem>>, %arg2: memref<3x24x12xbf16, #tpu.memory_space<vmem>>, %arg3: memref<1x12xf32, #tpu.memory_space<vmem>>, %arg4: memref<1x12xf32, #tpu.memory_space<vmem>>, %arg5: memref<1x256x8xf32, #tpu.memory_space<vmem>>, %arg6: memref<1x18x18x4xbf16, #tpu.memory_space<vmem>>) attributes {dimension_semantics = [#tpu.dimension_semantics<parallel>], iteration_bounds = array<i64: 2>, scalar_prefetch = 0 : i64, scratch_operands = 0 : i64, tpu.core_type = #tpu.core_type<tc>, window_params = [{transform_indices = @transform_0, window_bounds = array<i64: 1, 18, 18, 8>}, {pipeline_mode = #tpu.pipeline_mode<synchronous>, transform_indices = @transform_1, window_bounds = array<i64: 3, 24, 12>}, {pipeline_mode = #tpu.pipeline_mode<synchronous>, transform_indices = @transform_2, window_bounds = array<i64: 1, 12>}, {pipeline_mode = #tpu.pipeline_mode<synchronous>, transform_indices = @transform_3, window_bounds = array<i64: 1, 12>}, {transform_indices = @transform_4, window_bounds = array<i64: 1, 256, 8>}, {transform_indices = @transform_5, window_bounds = array<i64: 1, 18, 18, 4>}]} {
    %c0 = arith.constant 0 : index
    %c0_0 = arith.constant 0 : index
    %c0_1 = arith.constant 0 : index
    %c0_2 = arith.constant 0 : index
    %0 = vector.load %arg1[%c0, %c0_0, %c0_1, %c0_2] : memref<1x18x18x8xbf16, #tpu.memory_space<vmem>>, vector<1x18x18x8xbf16>
    %1 = vector.shape_cast %0 : vector<1x18x18x8xbf16> to vector<18x18x8xbf16>
    %2 = vector.extract_strided_slice %1 {offsets = [0, 0, 0], sizes = [18, 16, 8], strides = [1, 1, 1]} : vector<18x18x8xbf16> to vector<18x16x8xbf16>
    %3 = vector.extract_strided_slice %1 {offsets = [0, 1, 0], sizes = [18, 16, 8], strides = [1, 1, 1]} : vector<18x18x8xbf16> to vector<18x16x8xbf16>
    %4 = vector.extract_strided_slice %1 {offsets = [0, 2, 0], sizes = [18, 16, 8], strides = [1, 1, 1]} : vector<18x18x8xbf16> to vector<18x16x8xbf16>
    %5 = tpu.concatenate %2, %3, %4 in 2 : vector<18x16x8xbf16>, vector<18x16x8xbf16>, vector<18x16x8xbf16> -> vector<18x16x24xbf16>
    %c0_3 = arith.constant 0 : index
    %c0_4 = arith.constant 0 : index
    %6 = vector.load %arg3[%c0_3, %c0_4] : memref<1x12xf32, #tpu.memory_space<vmem>>, vector<1x12xf32>
    %7 = vector.shape_cast %6 : vector<1x12xf32> to vector<1x12xf32>
    %8 = vector.broadcast %7 : vector<1x12xf32> to vector<256x12xf32>
    %9 = vector.extract_strided_slice %5 {offsets = [0, 0, 0], sizes = [16, 16, 24], strides = [1, 1, 1]} : vector<18x16x24xbf16> to vector<16x16x24xbf16>
    %10 = vector.shape_cast %9 : vector<16x16x24xbf16> to vector<256x24xbf16>
    %c0_5 = arith.constant 0 : index
    %c0_6 = arith.constant 0 : index
    %c0_7 = arith.constant 0 : index
    %11 = vector.load %arg2[%c0_5, %c0_6, %c0_7] : memref<3x24x12xbf16, #tpu.memory_space<vmem>>, vector<1x24x12xbf16>
    %12 = vector.shape_cast %11 : vector<1x24x12xbf16> to vector<24x12xbf16>
    %cst = arith.constant dense<0.000000e+00> : vector<256x12xf32>
    %13 = tpu.matmul %10, %12, %cst {dimension_numbers = #tpu.dot_dimension_numbers<[1], [0], [0], [1], [0, 0, 1, 1], [], []>} : vector<256x24xbf16>, vector<24x12xbf16>, vector<256x12xf32> -> vector<256x12xf32>
    %14 = arith.addf %8, %13 : vector<256x12xf32>
    %15 = vector.extract_strided_slice %5 {offsets = [1, 0, 0], sizes = [16, 16, 24], strides = [1, 1, 1]} : vector<18x16x24xbf16> to vector<16x16x24xbf16>
    %16 = vector.shape_cast %15 : vector<16x16x24xbf16> to vector<256x24xbf16>
    %c1 = arith.constant 1 : index
    %c0_8 = arith.constant 0 : index
    %c0_9 = arith.constant 0 : index
    %17 = vector.load %arg2[%c1, %c0_8, %c0_9] : memref<3x24x12xbf16, #tpu.memory_space<vmem>>, vector<1x24x12xbf16>
    %18 = vector.shape_cast %17 : vector<1x24x12xbf16> to vector<24x12xbf16>
    %cst_10 = arith.constant dense<0.000000e+00> : vector<256x12xf32>
    %19 = tpu.matmul %16, %18, %cst_10 {dimension_numbers = #tpu.dot_dimension_numbers<[1], [0], [0], [1], [0, 0, 1, 1], [], []>} : vector<256x24xbf16>, vector<24x12xbf16>, vector<256x12xf32> -> vector<256x12xf32>
    %20 = arith.addf %14, %19 : vector<256x12xf32>
    %21 = vector.extract_strided_slice %5 {offsets = [2, 0, 0], sizes = [16, 16, 24], strides = [1, 1, 1]} : vector<18x16x24xbf16> to vector<16x16x24xbf16>
    %22 = vector.shape_cast %21 : vector<16x16x24xbf16> to vector<256x24xbf16>
    %c2 = arith.constant 2 : index
    %c0_11 = arith.constant 0 : index
    %c0_12 = arith.constant 0 : index
    %23 = vector.load %arg2[%c2, %c0_11, %c0_12] : memref<3x24x12xbf16, #tpu.memory_space<vmem>>, vector<1x24x12xbf16>
    %24 = vector.shape_cast %23 : vector<1x24x12xbf16> to vector<24x12xbf16>
    %cst_13 = arith.constant dense<0.000000e+00> : vector<256x12xf32>
    %25 = tpu.matmul %22, %24, %cst_13 {dimension_numbers = #tpu.dot_dimension_numbers<[1], [0], [0], [1], [0, 0, 1, 1], [], []>} : vector<256x24xbf16>, vector<24x12xbf16>, vector<256x12xf32> -> vector<256x12xf32>
    %26 = arith.addf %20, %25 : vector<256x12xf32>
    %cst_14 = arith.constant 0.000000e+00 : f32
    %27 = vector.broadcast %cst_14 : f32 to vector<256x12xf32>
    %28 = arith.cmpf oge, %26, %27 : vector<256x12xf32>
    %c0_15 = arith.constant 0 : index
    %c0_16 = arith.constant 0 : index
    %29 = vector.load %arg4[%c0_15, %c0_16] : memref<1x12xf32, #tpu.memory_space<vmem>>, vector<1x12xf32>
    %30 = vector.broadcast %29 : vector<1x12xf32> to vector<256x12xf32>
    %31 = arith.mulf %26, %30 : vector<256x12xf32>
    %32 = arith.select %28, %26, %31 : vector<256x12xi1>, vector<256x12xf32>
    %33 = vector.extract_strided_slice %32 {offsets = [0, 0], sizes = [256, 8], strides = [1, 1]} : vector<256x12xf32> to vector<256x8xf32>
    %c0_17 = arith.constant 0 : index
    %c0_18 = arith.constant 0 : index
    %c0_19 = arith.constant 0 : index
    %34 = vector.load %arg5[%c0_17, %c0_18, %c0_19] : memref<1x256x8xf32, #tpu.memory_space<vmem>>, vector<1x256x8xf32>
    %35 = vector.shape_cast %34 : vector<1x256x8xf32> to vector<256x8xf32>
    %36 = vector.shape_cast %33 : vector<256x8xf32> to vector<1x256x8xf32>
    tpu.vector_store %arg5[%c0_17, %c0_18, %c0_19], %36 {strides = array<i32>} : memref<1x256x8xf32, #tpu.memory_space<vmem>>, vector<1x256x8xf32>,
    %37 = vector.extract_strided_slice %32 {offsets = [0, 8], sizes = [256, 4], strides = [1, 1]} : vector<256x12xf32> to vector<256x4xf32>
    %38 = arith.truncf %37 : vector<256x4xf32> to vector<256x4xbf16>
    %39 = vector.shape_cast %38 : vector<256x4xbf16> to vector<16x16x4xbf16>
    %cst_20 = arith.constant 0.000000e+00 : bf16
    %40 = vector.broadcast %cst_20 : bf16 to vector<1x16x4xbf16>
    %cst_21 = arith.constant 0.000000e+00 : bf16
    %41 = vector.broadcast %cst_21 : bf16 to vector<18x1x4xbf16>
    %42 = tpu.concatenate %40, %39, %40 in 0 : vector<1x16x4xbf16>, vector<16x16x4xbf16>, vector<1x16x4xbf16> -> vector<18x16x4xbf16>
    %43 = tpu.concatenate %41, %42, %41 in 1 : vector<18x1x4xbf16>, vector<18x16x4xbf16>, vector<18x1x4xbf16> -> vector<18x18x4xbf16>
    %c0_22 = arith.constant 0 : index
    %c0_23 = arith.constant 0 : index
    %c0_24 = arith.constant 0 : index
    %c0_25 = arith.constant 0 : index
    %44 = vector.load %arg6[%c0_22, %c0_23, %c0_24, %c0_25] : memref<1x18x18x4xbf16, #tpu.memory_space<vmem>>, vector<1x18x18x4xbf16>
    %45 = vector.shape_cast %44 : vector<1x18x18x4xbf16> to vector<18x18x4xbf16>
    %46 = vector.shape_cast %43 : vector<18x18x4xbf16> to vector<1x18x18x4xbf16>
    tpu.vector_store %arg6[%c0_22, %c0_23, %c0_24, %c0_25], %46 {strides = array<i32>} : memref<1x18x18x4xbf16, #tpu.memory_space<vmem>>, vector<1x18x18x4xbf16>,
    return
  }
  func.func @transform_0(%arg0: i32) -> (i32, i32, i32, i32) {
    %c0_i32 = arith.constant 0 : i32
    %c0_i32_0 = arith.constant 0 : i32
    %c0_i32_1 = arith.constant 0 : i32
    %c0_i32_2 = arith.constant 0 : i32
    return %arg0, %c0_i32, %c0_i32_0, %c0_i32_1 : i32, i32, i32, i32
  }
  func.func @transform_1(%arg0: i32) -> (i32, i32, i32) {
    %c0_i32 = arith.constant 0 : i32
    %c0_i32_0 = arith.constant 0 : i32
    %c0_i32_1 = arith.constant 0 : i32
    %c0_i32_2 = arith.constant 0 : i32
    return %c0_i32, %c0_i32_0, %c0_i32_1 : i32, i32, i32
  }
  func.func @transform_2(%arg0: i32) -> (i32, i32) {
    %c0_i32 = arith.constant 0 : i32
    %c0_i32_0 = arith.constant 0 : i32
    %c0_i32_1 = arith.constant 0 : i32
    return %c0_i32, %c0_i32_0 : i32, i32
  }
  func.func @transform_3(%arg0: i32) -> (i32, i32) {
    %c0_i32 = arith.constant 0 : i32
    %c0_i32_0 = arith.constant 0 : i32
    %c0_i32_1 = arith.constant 0 : i32
    return %c0_i32, %c0_i32_0 : i32, i32
  }
  func.func @transform_4(%arg0: i32) -> (i32, i32, i32) {
    %c0_i32 = arith.constant 0 : i32
    %c0_i32_0 = arith.constant 0 : i32
    %c0_i32_1 = arith.constant 0 : i32
    return %arg0, %c0_i32, %c0_i32_0 : i32, i32, i32
  }
  func.func @transform_5(%arg0: i32) -> (i32, i32, i32, i32) {
    %c0_i32 = arith.constant 0 : i32
    %c0_i32_0 = arith.constant 0 : i32
    %c0_i32_1 = arith.constant 0 : i32
    %c0_i32_2 = arith.constant 0 : i32
    return %arg0, %c0_i32, %c0_i32_0, %c0_i32_1 : i32, i32, i32, i32
  }
}

</mosaic_0001>

<bundles_post_ra>
// kernel: tpu_custom_call.1
= control target key start
LH: loop header
LB: loop body
LE: loop exit
PB: predicated region body
PF: predicated region fallthrough
CT: control target
= control target key end

     0   :  { %s2338_s18 = smov 0   ;;  %s3129_s0 = inlined_call_operand.vmem [shape: bf16[2,18,18,8], index: 0, kind: input, shape index: {}]   ;;  %s3130_s1 = inlined_call_operand.vmem [shape: bf16[3,24,12], index: 1, kind: input, shape index: {}]   ;;  %s3131_s2 = inlined_call_operand.vmem [shape: f32[1,12], index: 2, kind: input, shape index: {}]   ;;  %s3132_s3 = inlined_call_operand.vmem [shape: f32[1,12], index: 3, kind: input, shape index: {}]   ;;  %s3133_s4 = inlined_call_operand.vmem [shape: f32[2,256,8], index: 4, kind: output, shape index: {0}]   ;;  %s3134_s5 = inlined_call_operand.vmem [shape: bf16[2,18,18,4], index: 5, kind: output, shape index: {1}]  }
   0x1 LB: > { %s2104_s19 = sadd.s32 4294967295, %s2302_s18   ;;  %p2108_p0 = scmp.ge.s32.totalorder %s2302_s18, 1  ;;  %s2302_s18 = sphi %s2338_s18, %s16_s18  }
   0x2   : > { %p190_p1 = scmp.lt.s32.totalorder %s2302_s18, 3 }
   0x4   : > { %p191_p2 = pnand %p2108_p0, %p190_p1 }
   0x5   : > { %p223_p3 = scmp.lt.s32.totalorder (!%p191_p2), %s2104_s19, 1  ;;  %s2304_s24 = smov (!%p191_p2), 16  }
   0x6   : > { %194 = sbr.rel (%p191_p2) target bundleno = 605 (0x25d), region = 36  ;;  %s2305_s25 = smov (!%p191_p2), 8  }
   0xb   : > { %s3138_s19 = smov (!%p223_p3, %s2104_s19), 1  ;;  %vm690_vm0 = vcmask 1046528   ;;  %vm437_vm1 = vsmask.f32 7424  ;;  %vm904_vm2 = vcmask 1043456   ;;  %vm781_vm3 = vcmask 64512  }
   0xc   : > { %s2281_s20 = smul.u32 216, %s3138_s19  ;;  %vm818_vm4 = vcmask 130048   ;;  %vm871_vm5 = vcmask 195584   ;;  %s2253_s17 = sshll.u32 %s3138_s19, 8 }
   0xe   : > { %s2354_s23 = scalar_lea.vmem %s3129_s0, %s2281_s20  ;;  %s2841_s27 = scalar_lea.vmem %s3134_s5, %s2281_s20 }
   0xf   : > { %v2357_v0 = vld [vmem:[%s2354_s23 + $0x18] sm:$0xff]  ;;  %v247_v1 = vld [vmem:[%s2354_s23 + $0x20] sm:$0x1]  ;;  %v2361_v2 = vld [vmem:[%s2354_s23 + $0x90] sm:$0xff] }
  0x10   : > { %v403_v3 = vunpack.c.l.b16 %v247_v1  ;;  %v277_v4 = vld [vmem:[%s2354_s23 + $0x98] sm:$0x1]  ;;  %v2365_v5 = vld [vmem:[%s2354_s23] sm:$0xff]  ;;  %v241_v6 = vld [vmem:[%s2354_s23 + $0x8] sm:$0x1]  ;;  %v463_v7 = vshrl.u32 %v2357_v0, 16 }
  0x11   : > { %v465_v8 = vshll.u32 %v2357_v0, 16  ;;  %v413_v9 = vunpack.c.l.b16 %v277_v4  ;;  %v697_v11 = vrot.slane %v2357_v0, 1  ;;  %v585_v12 = vshll.u32 %v2361_v2, 16  ;;  %v244_v13 = vld [vmem:[%s2354_s23 + $0x14] sm:$0x1]  ;;  %v2377_v28 = vld [vmem:[%s2354_s23 + $0xc] sm:$0xff] }
  0x12   : > { %v421_v10 = vpack.c.b16 %v403_v3, %v403_v3  ;;  %v583_v16 = vshrl.u32 %v2361_v2, 16  ;;  %v401_v17 = vunpack.c.l.b16 %v241_v6  ;;  %v691_v21 = vrot.slane %v2365_v5, 1  ;;  %v250_v41 = vld [vmem:[%s2354_s23 + $0x2c] sm:$0x1]  ;;  %v280_v42 = vld [vmem:[%s2354_s23 + $0xa4] sm:$0x1] }
  0x13   : > { %v467_v14 = vrot.slane %v465_v8, 1  ;;  %v431_v15 = vpack.c.b16 %v413_v9, %v413_v9  ;;  %v587_v20 = vrot.slane %v585_v12, 1  ;;  %v402_v25 = vunpack.c.l.b16 %v244_v13  ;;  %v2394_v52 = vld [vmem:[%s2354_s23 + $0x9c] sm:$0xff]  ;;  %v2401_v58 = vld [vmem:[%s2354_s23 + $0x24] sm:$0xff]  ;;  %v283_v59 = vld [vmem:[%s2354_s23 + $0xb0] sm:$0x1] }
  0x14   : > { %v698_v18 = vrot.slane %v421_v10, 1  ;;  %v470_v19 = vshll.u32 %v421_v10, 16  ;;  %v419_v24 = vpack.c.b16 %v401_v17, %v401_v17  ;;  %v727_v31 = vrot.slane %v2361_v2, 1  ;;  %v253_v1 = vld [vmem:[%s2354_s23 + $0x38] sm:$0x1] }
  0x15   : > { %v468_v22 = vor.u32 %v467_v14, %v463_v7  ;;  %v590_v23 = vshll.u32 %v431_v15, 16  ;;  %v728_v32 = vrot.slane %v431_v15, 1  ;;  %v588_v33 = vor.u32 %v587_v20, %v583_v16  ;;  %v2411_v7 = vld [vmem:[%s2354_s23 + $0xa8] sm:$0xff]  ;;  %v2416_v16 = vld [vmem:[%s2354_s23 + $0x30] sm:$0xff] }
  0x16   : > { %v699_v26 = vsel %vm690_vm0, %v697_v11, %v698_v18  ;;  %v472_v27 = vrot.slane %v470_v19, 1  ;;  %v692_v29 = vrot.slane %v419_v24, 1  ;;  %v420_v36 = vpack.c.b16 %v402_v25, %v402_v25 }
  0x17   : > { %749 = vrot.lane.b32.xlu1 %v699_v26, %s2304_s24  ;;  %v592_v34 = vrot.slane %v590_v23, 1  ;;  %v453_v37 = vshll.u32 %v2377_v28, 16  ;;  %v439_v38 = vshrl.u32 %v2365_v5, 16  ;;  %v441_v39 = vshll.u32 %v2365_v5, 16 }
  0x18   : > { %v473_v30 = vsel %vm437_vm1, %v468_v22, %v472_v27  ;;  %v693_v35 = vsel %vm690_vm0, %v691_v21, %v692_v29  ;;  %v446_v40 = vshll.u32 %v419_v24, 16  ;;  %v729_v43 = vsel %vm690_vm0, %v727_v31, %v728_v32  ;;  %v256_v24 = vld [vmem:[%s2354_s23 + $0x44] sm:$0x1] }
  0x19   : > { %658 = vrot.lane.b32.xlu0 %v473_v30, %s2305_s25  ;;  %745 = vrot.lane.b32.xlu2 %v693_v35, %s2304_s24  ;;  %v443_v44 = vrot.slane %v441_v39, 1  ;;  %v593_v46 = vsel %vm437_vm1, %v588_v33, %v592_v34  ;;  %v451_v47 = vshrl.u32 %v2377_v28, 16  ;;  %v458_v48 = vshll.u32 %v420_v36, 16 }
  0x1a   : > { %v448_v45 = vrot.slane %v446_v40, 1  ;;  %v455_v49 = vrot.slane %v453_v37, 1  ;;  %v404_v51 = vunpack.c.l.b16 %v250_v41  ;;  %v414_v53 = vunpack.c.l.b16 %v280_v42  ;;  %v286_v42 = vld [vmem:[%s2354_s23 + $0xbc] sm:$0x1] }
  0x1b   : > { %v444_v50 = vor.u32 %v443_v44, %v439_v38  ;;  %v694_v54 = vrot.slane %v2377_v28, 1  ;;  %v695_v55 = vrot.slane %v420_v36, 1  ;;  %v460_v57 = vrot.slane %v458_v48, 1  ;;  %v2433_v36 = vld [vmem:[%s2354_s23 + $0x3c] sm:$0xff]  ;;  %v2443_v48 = vld [vmem:[%s2354_s23 + $0xb4] sm:$0xff] }
  0x1c   : > { %v456_v60 = vor.u32 %v455_v49, %v451_v47  ;;  %v422_v61 = vpack.c.b16 %v404_v51, %v404_v51  ;;  %v432_v62 = vpack.c.b16 %v414_v53, %v414_v53  ;;  %v597_v63 = vshll.u32 %v2394_v52, 16 }
  0x1d   : > { %v449_v56 = vsel %vm437_vm1, %v444_v50, %v448_v45  ;;  %v475_v3 = vshrl.u32 %v2401_v58, 16  ;;  %v477_v4 = vshll.u32 %v2401_v58, 16  ;;  %v696_v6 = vsel %vm690_vm0, %v694_v54, %v695_v55 }
  0x1e   : > { %v415_v8 = vunpack.c.l.b16 %v283_v59  ;;  %v482_v9 = vshll.u32 %v422_v61, 16  ;;  %v595_v10 = vshrl.u32 %v2394_v52, 16  ;;  %v405_v11 = vunpack.c.l.b16 %v253_v1 }
  0x1f   : > { %769 = vrot.lane.b32.xlu1 %v729_v43, %s2304_s24  ;;  %v479_v12 = vrot.slane %v477_v4, 1  ;;  %v461_v13 = vsel %vm437_vm1, %v456_v60, %v460_v57  ;;  %v599_v14 = vrot.slane %v597_v63, 1  ;;  %v602_v15 = vshll.u32 %v432_v62, 16  ;;  %v259_v63 = vld [vmem:[%s2354_s23 + $0x50] sm:$0x1] }
  0x20   : > { %v484_v17 = vrot.slane %v482_v9, 1  ;;  %v700_v19 = vrot.slane %v2401_v58, 1  ;;  %v701_v20 = vrot.slane %v422_v61, 1  ;;  %v2420_v21 = vpack.c.b16 %v415_v8, %v415_v8 }
  0x21   : > { %678 = vrot.lane.b32.xlu0 %v593_v46, %s2305_s25  ;;  %654 = vrot.lane.b32.xlu2 %v449_v56, %s2305_s25  ;;  %v480_v18 = vor.u32 %v479_v12, %v475_v3  ;;  %v609_v22 = vshll.u32 %v2411_v7, 16  ;;  %v600_v25 = vor.u32 %v599_v14, %v595_v10  ;;  %v604_v26 = vrot.slane %v602_v15, 1  ;;  %v2457_v10 = vld [vmem:[%s2354_s23 + $0x48] sm:$0xff]  ;;  %v262_v12 = vld [vmem:[%s2354_s23 + $0x5c] sm:$0x1] }
  0x22   : > { %v423_v27 = vpack.c.b16 %v405_v11, %v405_v11  ;;  %v489_v29 = vshll.u32 %v2416_v16, 16  ;;  %v607_v30 = vshrl.u32 %v2411_v7, 16  ;;  %v730_v31 = vrot.slane %v2394_v52, 1 }
  0x23   : > { %v485_v23 = vsel %vm437_vm1, %v480_v18, %v484_v17  ;;  %v731_v32 = vrot.slane %v432_v62, 1  ;;  %v702_v33 = vsel %vm690_vm0, %v700_v19, %v701_v20  ;;  %v611_v34 = vrot.slane %v609_v22, 1  ;;  %v2466_v20 = vld [vmem:[%s2354_s23 + $0x54] sm:$0xff] }
  0x24   : > { %v614_v35 = vshll.u32 %v2420_v21, 16  ;;  %v406_v37 = vunpack.c.l.b16 %v256_v24  ;;  %v605_v38 = vsel %vm437_vm1, %v600_v25, %v604_v26  ;;  %v487_v39 = vshrl.u32 %v2416_v16, 16 }
  0x25   : > { %v491_v40 = vrot.slane %v489_v29, 1  ;;  %v494_v41 = vshll.u32 %v423_v27, 16  ;;  %v732_v43 = vsel %vm690_vm0, %v730_v31, %v731_v32  ;;  %v612_v44 = vor.u32 %v611_v34, %v607_v30 }
  0x26   : > { %v616_v45 = vrot.slane %v614_v35, 1  ;;  %v424_v46 = vpack.c.b16 %v406_v37, %v406_v37  ;;  %v501_v47 = vshll.u32 %v2433_v36, 16  ;;  %v416_v49 = vunpack.c.l.b16 %v286_v42 }
  0x27   : > { %747 = vrot.lane.b32.xlu1 %v696_v6, %s2304_s24  ;;  %v492_v50 = vor.u32 %v491_v40, %v487_v39  ;;  %v496_v51 = vrot.slane %v494_v41, 1  ;;  %v703_v53 = vrot.slane %v2416_v16, 1  ;;  %v704_v54 = vrot.slane %v423_v27, 1 }
  0x28   : > { %v621_v55 = vshll.u32 %v2443_v48, 16  ;;  %v617_v56 = vsel %vm437_vm1, %v612_v44, %v616_v45  ;;  %v499_v57 = vshrl.u32 %v2433_v36, 16  ;;  %v503_v59 = vrot.slane %v501_v47, 1 }
  0x29   : > { %656 = vrot.lane.b32.xlu0 %v461_v13, %s2305_s25  ;;  %660 = vrot.lane.b32.xlu2 %v485_v23, %s2305_s25  ;;  %v506_v60 = vshll.u32 %v424_v46, 16  ;;  %v434_v61 = vpack.c.b16 %v416_v49, %v416_v49  ;;  %v497_v62 = vsel %vm437_vm1, %v492_v50, %v496_v51  ;;  %v705_v1 = vsel %vm690_vm0, %v703_v53, %v704_v54  ;;  %v2490_v51 = vld [vmem:[%s2354_s23 + $0x60] sm:$0xff]  ;;  %v265_v53 = vld [vmem:[%s2354_s23 + $0x68] sm:$0x1] }
  0x2a   : > { %v619_v3 = vshrl.u32 %v2443_v48, 16  ;;  %v623_v4 = vrot.slane %v621_v55, 1  ;;  %v504_v8 = vor.u32 %v503_v59, %v499_v57  ;;  %v407_v11 = vunpack.c.l.b16 %v259_v63  ;;  %v861_v54 = vld [vmem:[%s3130_s1 + $0x8] sm:$0xf] }
  0x2b   : > { %v626_v6 = vshll.u32 %v434_v61, 16  ;;  %v508_v9 = vrot.slane %v506_v60, 1  ;;  %v733_v13 = vrot.slane %v2411_v7, 1  ;;  %v734_v14 = vrot.slane %v2420_v21, 1 }
  0x2c   : > { %v624_v15 = vor.u32 %v623_v4, %v619_v3  ;;  %v513_v18 = vshll.u32 %v2457_v10, 16  ;;  %v408_v22 = vunpack.c.l.b16 %v262_v12  ;;  %v425_v23 = vpack.c.b16 %v407_v11, %v407_v11 }
  0x2d   : > { %v628_v17 = vrot.slane %v626_v6, 1  ;;  %v509_v19 = vsel %vm437_vm1, %v504_v8, %v508_v9  ;;  %v735_v24 = vsel %vm690_vm0, %v733_v13, %v734_v14  ;;  %v511_v21 = vshrl.u32 %v2457_v10, 16  ;;  %v2272_v8 = vld [vmem:[%s3130_s1] sm:$0xff] }
  0x2e   : > { %v515_v26 = vrot.slane %v513_v18, 1  ;;  %v518_v27 = vshll.u32 %v425_v23, 16  ;;  %v736_v29 = vrot.slane %v2443_v48, 1  ;;  %v737_v30 = vrot.slane %v434_v61, 1  ;;  %v2230_v13 = vld [vmem:[%s3130_s1 + $0x20] sm:$0xf] }
  0x2f   : > { %751 = vrot.lane.b32.xlu1 %v702_v33, %s2304_s24  ;;  %v629_v25 = vsel %vm437_vm1, %v624_v15, %v628_v17  ;;  %v426_v31 = vpack.c.b16 %v408_v22, %v408_v22  ;;  %v525_v32 = vshll.u32 %v2466_v20, 16  ;;  %v706_v33 = vrot.slane %v2433_v36, 1  ;;  %v268_v22 = vld [vmem:[%s2354_s23 + $0x74] sm:$0x1] }
  0x30   : > { %v707_v34 = vrot.slane %v424_v46, 1  ;;  %v516_v35 = vor.u32 %v515_v26, %v511_v21  ;;  %v520_v37 = vrot.slane %v518_v27, 1  ;;  %v523_v39 = vshrl.u32 %v2466_v20, 16  ;;  %v289_v26 = vld [vmem:[%s2354_s23 + $0xc8] sm:$0x1] }
  0x31   : > { %680 = vrot.lane.b32.xlu0 %v605_v38, %s2305_s25  ;;  %771 = vrot.lane.b32.xlu2 %v732_v43, %s2304_s24  ;;  %v738_v38 = vsel %vm690_vm0, %v736_v29, %v737_v30  ;;  %v527_v40 = vrot.slane %v525_v32, 1  ;;  %v530_v41 = vshll.u32 %v426_v31, 16  ;;  %v709_v46 = vrot.slane %v2457_v10, 1  ;;  %v2524_v30 = vld [vmem:[%s2354_s23 + $0xc0] sm:$0xff]  ;;  %v2529_v32 = vld [vmem:[%s3130_s1 + $0x18] sm:$0xff] }
  0x32   : > { %v708_v42 = vsel %vm690_vm0, %v706_v33, %v707_v34  ;;  %v521_v43 = vsel %vm437_vm1, %v516_v35, %v520_v37  ;;  %v710_v47 = vrot.slane %v425_v23, 1  ;;  %v409_v55 = vunpack.c.l.b16 %v265_v53 }
  0x33   : > { %v528_v44 = vor.u32 %v527_v40, %v523_v39  ;;  %v532_v45 = vrot.slane %v530_v41, 1  ;;  %v535_v57 = vshrl.u32 %v2490_v51, 16  ;;  %v537_v59 = vshll.u32 %v2490_v51, 16 }
  0x34   : > { %v711_v50 = vsel %vm690_vm0, %v709_v46, %v710_v47  ;;  %v427_v60 = vpack.c.b16 %v409_v55, %v409_v55  ;;  %v712_v14 = vrot.slane %v2466_v20, 1  ;;  %v713_v15 = vrot.slane %v426_v31, 1  ;;  %v271_v47 = vld [vmem:[%s2354_s23 + $0x80] sm:$0x1] }
  0x35   : > { %v533_v49 = vsel %vm437_vm1, %v528_v44, %v532_v45  ;;  %v539_v63 = vrot.slane %v537_v59, 1  ;;  %v1177_v17 = vunpack.c.l.b16 %v2230_v13  ;;  %v417_v31 = vunpack.c.l.b16 %v289_v26 }
  0x36   : > { %v716_v4 = vrot.slane %v427_v60, 1  ;;  %v714_v18 = vsel %vm690_vm0, %v712_v14, %v713_v15  ;;  %v633_v35 = vshll.u32 %v2524_v30, 16  ;;  %v631_v37 = vshrl.u32 %v2524_v30, 16 }
  0x37   : > { %682 = vrot.lane.b32.xlu1 %v617_v56, %s2305_s25  ;;  %v867_v56 = vunpack.c.l.b16 %v861_v54  ;;  %v540_v6 = vor.u32 %v539_v63, %v535_v57  ;;  %v435_v34 = vpack.c.b16 %v417_v31, %v417_v31 }
  0x39   : > { %662 = vrot.lane.b32.xlu0 %v497_v62, %s2305_s25  ;;  %753 = vrot.lane.b32.xlu2 %v705_v1, %s2304_s24  ;;  %v869_v61 = vpack.c.b16 %v867_v56, %v867_v56  ;;  %v715_v62 = vrot.slane %v2490_v51, 1  ;;  %v542_v1 = vshll.u32 %v427_v60, 16  ;;  %v638_v39 = vshll.u32 %v435_v34, 16  ;;  %v2273_v56 = vld [vmem:[%s3130_s1 + $0xc] sm:$0xff] }
  0x3b   : > { %v906_v3 = vsel %vm904_vm2, %v869_v61, 0  ;;  %v544_v9 = vrot.slane %v542_v1, 1  ;;  %v717_v11 = vsel %vm690_vm0, %v715_v62, %v716_v4  ;;  %v640_v41 = vrot.slane %v638_v39, 1 }
  0x3c   : > { %914 = vmatpush.bf16.msra.mxu0 %v906_v3  ;;  %2275 = vmatpush.bf16.msra.mxu3 %v906_v3 }
  0x3d   : > { %v545_v12 = vsel %vm437_vm1, %v540_v6, %v544_v9 }
  0x3f   : > { %664 = vrot.lane.b32.xlu1 %v509_v19, %s2305_s25  ;;  %v1179_v19 = vpack.c.b16 %v1177_v17, %v1177_v17 }
  0x40   : > { %915 = vmatpush.bf16.msra.mxu0 %v2272_v8  ;;  %2276 = vmatpush.bf16.msra.mxu3 %v2272_v8 }
  0x41   : > { %773 = vrot.lane.b32.xlu0 %v735_v24, %s2304_s24  ;;  %684 = vrot.lane.b32.xlu2 %v629_v25, %s2305_s25  ;;  %v2515_v23 = vsel %vm904_vm2, %v1179_v19, 0  ;;  %v410_v24 = vunpack.c.l.b16 %v268_v22  ;;  %v2519_v25 = vld [vmem:[%s2354_s23 + $0x6c] sm:$0xff]  ;;  %v740_v19 = vrot.slane %v435_v34, 1 }
  0x42   : > { %1192 = vmatpush.bf16.msra.mxu2 %v2515_v23  ;;  %v718_v27 = vrot.slane %v2519_v25, 1  ;;  %v549_v63 = vshll.u32 %v2519_v25, 16  ;;  %v547_v9 = vshrl.u32 %v2519_v25, 16  ;;  %v274_v22 = vld [vmem:[%s2354_s23 + $0x8c] sm:$0x1] }
  0x43   : > { %v428_v21 = vpack.c.b16 %v410_v24, %v410_v24  ;;  %v412_v26 = vunpack.c.l.b16 %v274_v22 }
  0x45   : > { %v719_v29 = vrot.slane %v428_v21, 1  ;;  %v554_v14 = vshll.u32 %v428_v21, 16  ;;  %v430_v21 = vpack.c.b16 %v412_v26, %v412_v26 }
  0x46   : > { %1193 = vmatpush.bf16.msra.mxu2 %v2529_v32 }
  0x47   : > { %775 = vrot.lane.b32.xlu1 %v738_v38, %s2304_s24  ;;  %v720_v33 = vsel %vm690_vm0, %v718_v27, %v719_v29  ;;  %v635_v38 = vrot.slane %v633_v35, 1  ;;  %v2568_v29 = vld [vmem:[%s2354_s23 + $0x84] sm:$0xff] }
  0x48   : > { %v724_v35 = vrot.slane %v2568_v29, 1 }
  0x49   : > { %755 = vrot.lane.b32.xlu0 %v708_v42, %s2304_s24  ;;  %666 = vrot.lane.b32.xlu2 %v521_v43, %s2305_s25  ;;  %v636_v40 = vor.u32 %v635_v38, %v631_v37  ;;  %v2207_v43 = vld [vmem:[%s3130_s1 + $0x14] sm:$0xf]  ;;  %v725_v37 = vrot.slane %v430_v21, 1 }
  0x4a   : > { %v1038_v44 = vunpack.c.l.b16 %v2207_v43 }
  0x4b   : > { %v641_v42 = vsel %vm437_vm1, %v636_v40, %v640_v41  ;;  %v726_v34 = vsel %vm690_vm0, %v724_v35, %v725_v37 }
  0x4c   : > { %v1040_v46 = vpack.c.b16 %v1038_v44, %v1038_v44 }
  0x4e   : > { %v1045_v53 = vsel %vm904_vm2, %v1040_v46, 0 }
  0x4f   : > { %668 = vrot.lane.b32.xlu1 %v533_v49, %s2305_s25  ;;  %v2543_v49 = vld [vmem:[%s2354_s23 + $0x78] sm:$0xff]  ;;  %2277 = vmatpush.bf16.msrb.mxu3 %v1045_v53 }
  0x50   : > { %1053 = vmatpush.bf16.msra.mxu1 %v1045_v53  ;;  %v561_v55 = vshll.u32 %v2543_v49, 16  ;;  %v559_v57 = vshrl.u32 %v2543_v49, 16  ;;  %v721_v3 = vrot.slane %v2543_v49, 1  ;;  %v578_v53 = vshll.u32 %v430_v21, 16 }
  0x51   : > { %757 = vrot.lane.b32.xlu0 %v711_v50, %s2304_s24  ;;  %759 = vrot.lane.b32.xlu2 %v714_v18, %s2304_s24  ;;  %v411_v50 = vunpack.c.l.b16 %v271_v47  ;;  %v739_v18 = vrot.slane %v2524_v30, 1 }
  0x52   : > { %v563_v59 = vrot.slane %v561_v55, 1 }
  0x53   : > { %v429_v54 = vpack.c.b16 %v411_v50, %v411_v50  ;;  %2278 = vmatpush.bf16.msrb.mxu3 %v2273_v56  ;;  %v741_v24 = vsel %vm690_vm0, %v739_v18, %v740_v19  ;;  %v571_v50 = vshrl.u32 %v2568_v29, 16 }
  0x54   : > { %1054 = vmatpush.bf16.msra.mxu1 %v2273_v56  ;;  %v564_v61 = vor.u32 %v563_v59, %v559_v57  ;;  %v580_v57 = vrot.slane %v578_v53, 1 }
  0x55   : > { %v566_v60 = vshll.u32 %v429_v54, 16  ;;  %v722_v4 = vrot.slane %v429_v54, 1 }
  0x57   : > { %761 = vrot.lane.b32.xlu1 %v717_v11, %s2304_s24  ;;  %v568_v62 = vrot.slane %v566_v60, 1  ;;  %v551_v11 = vrot.slane %v549_v63, 1  ;;  %v723_v13 = vsel %vm690_vm0, %v721_v3, %v722_v4 }
  0x59   : > { %670 = vrot.lane.b32.xlu0 %v545_v12, %s2305_s25  ;;  %v569_v8 = vsel %vm437_vm1, %v564_v61, %v568_v62  ;;  %v552_v15 = vor.u32 %v551_v11, %v547_v9  ;;  %v292_v61 = vld [vmem:[%s2354_s23 + $0xd4] sm:$0x1]  ;;  %v2609_v62 = vld [vmem:[%s2354_s23 + $0xcc] sm:$0xff]  ;;  %s2710_s23 = scalar_lea.vmem %s3133_s4, %s2253_s17 }
  0x5a   : > { %v418_v63 = vunpack.c.l.b16 %v292_v61  ;;  %v645_v3 = vshll.u32 %v2609_v62, 16 }
  0x5f   : > { %763 = vrot.lane.b32.xlu1 %v720_v33, %s2304_s24 }
  0x61   : > { %686 = vrot.lane.b32.xlu0 %v641_v42, %s2305_s25 }
  0x67   : > { %765 = vrot.lane.b32.xlu1 %v723_v13, %s2304_s24 }
  0x69   : > { %674 = vrot.lane.b32.xlu0 %v569_v8, %s2305_s25  ;;  %v647_v8 = vrot.slane %v645_v3, 1  ;;  %v2700_v3 = vld [vmem:[%s3132_s3] ss:$0 sm:$0xff] }
  0x71   : > { %767 = vrot.lane.b32.xlu0 %v726_v34, %s2304_s24 }
  0x73   : > { %v746_v45 = vpop.permute.xlu2 %745 }
  0x7b   : > { %v655_v1 = vpop.permute.xlu2 %654 }
  0x7c   : > { %v783_v6 = vsel %vm781_vm3, %v2365_v5, %v655_v1  ;;  %v556_v5 = vrot.slane %v554_v14, 1  ;;  %v436_v1 = vpack.c.b16 %v418_v63, %v418_v63 }
  0x7d   : > { %v820_v12 = vsel %vm818_vm4, %v783_v6, %v746_v45 }
  0x7e   : > { %2189 = vmatmul.msk.bf16.vlgmr.msra.gmra.mxu0 %vm871_vm5, %v820_v12  ;;  %v557_v17 = vsel %vm437_vm1, %v552_v15, %v556_v5  ;;  %v650_v9 = vshll.u32 %v436_v1, 16  ;;  %v743_v35 = vrot.slane %v436_v1, 1 }
  0x7f   : > { %672 = vrot.lane.b32.xlu2 %v557_v17, %s2305_s25 }
  0x80   : > { %v652_v12 = vrot.slane %v650_v9, 1 }
  0x87   : > { %777 = vrot.lane.b32.xlu2 %v741_v24, %s2304_s24 }
  0x89   : > { %v750_v27 = vpop.permute.xlu1 %749 }
  0x8b   : > { %v659_v31 = vpop.permute.xlu0 %658 }
  0x8c   : > { %v787_v33 = vsel %vm781_vm3, %v2357_v0, %v659_v31  ;;  %v661_v0 = vpop.permute.xlu2 %660 }
  0x8d   : > { %v824_v38 = vsel %vm818_vm4, %v787_v33, %v750_v27  ;;  %v789_v47 = vsel %vm781_vm3, %v2401_v58, %v661_v0  ;;  %v742_v33 = vrot.slane %v2609_v62, 1 }
  0x8e   : > { %2235 = vmatmul.msk.bf16.vlgmr.msra.gmra.mxu2 %vm871_vm5, %v824_v38 }
  0x91   : > { %v770_v39 = vpop.permute.xlu1 %769 }
  0x93   : > { %v679_v40 = vpop.permute.xlu0 %678 }
  0x94   : > { %v807_v41 = vsel %vm781_vm3, %v2361_v2, %v679_v40  ;;  %v573_v2 = vshll.u32 %v2568_v29, 16  ;;  %v772_v54 = vpop.permute.xlu2 %771 }
  0x95   : > { %v2581_v42 = vsel %vm818_vm4, %v807_v41, %v770_v39 }
  0x96   : > { %2201 = vmatmul.msk.bf16.vlgmr.msra.gmra.mxu3 %vm871_vm5, %v2581_v42 }
  0x97   : > { %2279 = vmatpush.bf16.msra.mxu3 %v2515_v23 }
  0x99   : > { %v748_v43 = vpop.permute.xlu1 %747 }
  0x9b   : > { %v657_v44 = vpop.permute.xlu0 %656  ;;  %2280 = vmatpush.bf16.msra.mxu3 %v2529_v32  ;;  %v575_v32 = vrot.slane %v573_v2, 1 }
  0x9c   : > { %v785_v45 = vsel %vm781_vm3, %v2377_v28, %v657_v44  ;;  %v754_v14 = vpop.permute.xlu2 %753 }
  0x9d   : > { %v822_v46 = vsel %vm818_vm4, %v785_v45, %v748_v43  ;;  %v576_v56 = vor.u32 %v575_v32, %v571_v50 }
  0x9e   : > { %2190 = vmatmul.msk.bf16.gmra.mxu0 %vm871_vm5, %v822_v46  ;;  %2212 = vmatmul.msk.bf16.vlgmr.msra.gmra.mxu1 %vm871_vm5, %v822_v46 }
  0x9f   : > { %v581_v60 = vsel %vm437_vm1, %v576_v56, %v580_v57  ;;  %v2690_v57 = vld [vmem:[%s3131_s2] ss:$0 sm:$0xff] }
  0xa0   : > { %676 = vrot.lane.b32.xlu2 %v581_v60, %s2305_s25 }
  0xa1   : > { %v752_v23 = vpop.permute.xlu1 %751 }
  0xa2   : > { %v826_v28 = vsel %vm818_vm4, %v789_v47, %v752_v23 }
  0xa3   : > { %v681_v55 = vpop.permute.xlu0 %680  ;;  %2236 = vmatmul.msk.bf16.gmra.mxu2 %vm871_vm5, %v826_v28 }
  0xa4   : > { %v809_v59 = vsel %vm781_vm3, %v2394_v52, %v681_v55  ;;  %v643_v52 = vshrl.u32 %v2609_v62, 16  ;;  %v685_v22 = vpop.permute.xlu2 %684 }
  0xa5   : > { %v2601_v58 = vsel %vm818_vm4, %v809_v59, %v772_v54  ;;  %v813_v26 = vsel %vm781_vm3, %v2443_v48, %v685_v22 }
  0xa6   : > { %2202 = vmatmul.msk.bf16.gmra.mxu3 %vm871_vm5, %v2601_v58  ;;  %v648_v11 = vor.u32 %v647_v8, %v643_v52 }
  0xa8   : > { %v653_v15 = vsel %vm437_vm1, %v648_v11, %v652_v12 }
  0xa9   : > { %v683_v6 = vpop.permute.xlu1 %682  ;;  %688 = vrot.lane.b32.xlu1 %v653_v15, %s2305_s25 }
  0xaa   : > { %v811_v5 = vsel %vm781_vm3, %v2411_v7, %v683_v6 }
  0xab   : > { %v663_v4 = vpop.permute.xlu0 %662 }
  0xac   : > { %v791_v13 = vsel %vm781_vm3, %v2416_v16, %v663_v4  ;;  %v667_v37 = vpop.permute.xlu2 %666 }
  0xad   : > { %v828_v17 = vsel %vm818_vm4, %v791_v13, %v754_v14  ;;  %v795_v48 = vsel %vm781_vm3, %v2457_v10, %v667_v37 }
  0xae   : > { %2191 = vmatmul.msk.bf16.gmra.mxu0 %vm871_vm5, %v824_v38  ;;  %2213 = vmatmul.msk.bf16.gmra.mxu1 %vm871_vm5, %v824_v38 }
  0xb1   : > { %v665_v16 = vpop.permute.xlu1 %664 }
  0xb2   : > { %v793_v7 = vsel %vm781_vm3, %v2433_v36, %v665_v16  ;;  %v744_v36 = vsel %vm690_vm0, %v742_v33, %v743_v35 }
  0xb3   : > { %2237 = vmatmul.msk.bf16.gmra.mxu2 %vm871_vm5, %v828_v17  ;;  %v774_v18 = vpop.permute.xlu0 %773  ;;  %779 = vrot.lane.b32.xlu2 %v744_v36, %s2304_s24  ;;  %s2306_s24 = smov 120  }
  0xb4   : > { %v2624_v19 = vsel %vm818_vm4, %v811_v5, %v774_v18  ;;  %v760_v41 = vpop.permute.xlu2 %759 }
  0xb6   : > { %2203 = vmatmul.msk.bf16.gmra.mxu3 %vm871_vm5, %v2624_v19 }
  0xb9   : > { %v776_v27 = vpop.permute.xlu1 %775 }
  0xba   : > { %v2637_v31 = vsel %vm818_vm4, %v813_v26, %v776_v27 }
  0xbb   : > { %v756_v24 = vpop.permute.xlu0 %755 }
  0xbc   : > { %v830_v21 = vsel %vm818_vm4, %v793_v7, %v756_v24 }
  0xbe   : > { %2192 = vmatmul.msk.bf16.gmra.mxu0 %vm871_vm5, %v826_v28  ;;  %2214 = vmatmul.msk.bf16.gmra.mxu1 %vm871_vm5, %v826_v28 }
  0xc1   : > { %v669_v39 = vpop.permute.xlu1 %668 }
  0xc2   : > { %v797_v40 = vsel %vm781_vm3, %v2466_v20, %v669_v39 }
  0xc3   : > { %2238 = vmatmul.msk.bf16.gmra.mxu2 %vm871_vm5, %v830_v21  ;;  %v758_v38 = vpop.permute.xlu0 %757  ;;  %v834_v10 = vsel %vm818_vm4, %v797_v40, %v760_v41 }
  0xc4   : > { %v832_v34 = vsel %vm818_vm4, %v795_v48, %v758_v38 }
  0xc6   : > { %2204 = vmatmul.msk.bf16.gmra.mxu3 %vm871_vm5, %v2637_v31 }
  0xc9   : > { %v762_v44 = vpop.permute.xlu1 %761 }
  0xcb   : > { %v671_v0 = vpop.permute.xlu0 %670 }
  0xcc   : > { %v799_v43 = vsel %vm781_vm3, %v2490_v51, %v671_v0 }
  0xcd   : > { %v836_v20 = vsel %vm818_vm4, %v799_v43, %v762_v44 }
  0xce   : > { %2193 = vmatmul.msk.bf16.gmra.mxu0 %vm871_vm5, %v828_v17  ;;  %2215 = vmatmul.msk.bf16.gmra.mxu1 %vm871_vm5, %v828_v17 }
  0xd1   : > { %v764_v2 = vpop.permute.xlu1 %763 }
  0xd3   : > { %2239 = vmatmul.msk.bf16.gmra.mxu2 %vm871_vm5, %v832_v34  ;;  %v687_v46 = vpop.permute.xlu0 %686 }
  0xd4   : > { %v815_v47 = vsel %vm781_vm3, %v2524_v30, %v687_v46 }
  0xd6   : > { %2224 = vmatmul.msk.bf16.vlgmr.msrb.gmra.mxu3 %vm871_vm5, %v2601_v58 }
  0xd9   : > { %v673_v45 = vpop.permute.xlu2 %672  ;;  %v766_v54 = vpop.permute.xlu1 %765 }
  0xda   : > { %v801_v51 = vsel %vm781_vm3, %v2519_v25, %v673_v45 }
  0xdb   : > { %v838_v50 = vsel %vm818_vm4, %v801_v51, %v764_v2  ;;  %v675_v28 = vpop.permute.xlu0 %674 }
  0xdc   : > { %v803_v25 = vsel %vm781_vm3, %v2543_v49, %v675_v28 }
  0xdd   : > { %v840_v30 = vsel %vm818_vm4, %v803_v25, %v766_v54 }
  0xde   : > { %2194 = vmatmul.msk.bf16.gmra.mxu0 %vm871_vm5, %v830_v21  ;;  %2216 = vmatmul.msk.bf16.gmra.mxu1 %vm871_vm5, %v830_v21 }
  0xe1   : > { %v778_v23 = vpop.permute.xlu2 %777 }
  0xe2   : > { %v2677_v32 = vsel %vm818_vm4, %v815_v47, %v778_v23 }
  0xe3   : > { %2240 = vmatmul.msk.bf16.gmra.mxu2 %vm871_vm5, %v834_v10  ;;  %v768_v6 = vpop.permute.xlu0 %767 }
  0xe6   : > { %2225 = vmatmul.msk.bf16.gmra.mxu3 %vm871_vm5, %v2624_v19 }
  0xee   : > { %2195 = vmatmul.msk.bf16.gmra.mxu0 %vm871_vm5, %v832_v34  ;;  %2217 = vmatmul.msk.bf16.gmra.mxu1 %vm871_vm5, %v832_v34 }
  0xf3   : > { %2241 = vmatmul.msk.bf16.gmra.mxu2 %vm871_vm5, %v836_v20 }
  0xf6   : > { %2226 = vmatmul.msk.bf16.gmra.mxu3 %vm871_vm5, %v2637_v31 }
  0xfa   : > { %v677_v60 = vpop.permute.xlu2 %676 }
  0xfb   : > { %v917_v53 = vpop.f32.mrf.mxu0  ;;  %v805_v4 = vsel %vm781_vm3, %v2568_v29, %v677_v60 }
  0xfc   : > { %v997_v59 = vadd.f32 %v2690_v57, %v917_v53  ;;  %v842_v11 = vsel %vm818_vm4, %v805_v4, %v768_v6 }
  0xfe   : > { %2196 = vmatmul.msk.bf16.gmra.mxu0 %vm871_vm5, %v834_v10  ;;  %2218 = vmatmul.msk.bf16.gmra.mxu1 %vm871_vm5, %v834_v10 }
 0x103   : > { %2242 = vmatmul.msk.bf16.gmra.mxu2 %vm871_vm5, %v838_v50  ;;  %v919_v55 = vpop.f32.mrf.mxu0 }
 0x104   : > { %v998_v29 = vadd.f32 %v2690_v57, %v919_v55 }
 0x106   : > { %2227 = vmatmul.msk.bf16.gmra.mxu3 %vm871_vm5, %v2677_v32 }
 0x10d   : > { %v780_v60 = vpop.permute.xlu2 %779 }
 0x10e   : > { %2197 = vmatmul.msk.bf16.gmra.mxu0 %vm871_vm5, %v836_v20  ;;  %2219 = vmatmul.msk.bf16.gmra.mxu1 %vm871_vm5, %v836_v20 }
 0x111   : > { %v1195_v56 = vpop.f32.mrf.mxu2 }
 0x113   : > { %2243 = vmatmul.msk.bf16.gmra.mxu2 %vm871_vm5, %v840_v30 }
 0x116   : > { %2247 = vmatmul.msk.bf16.vlgmr.msra.gmra.mxu3 %vm871_vm5, %v2624_v19 }
 0x119   : > { %v2694_v49 = vpop.f32.mrf.mxu3  ;;  %v1197_v52 = vpop.f32.mrf.mxu2 }
 0x11b   : > { %v922_v61 = vpop.f32.mrf.mxu0  ;;  %v1056_v63 = vpop.f32.mrf.mxu1 }
 0x11c   : > { %v1136_v1 = vadd.f32 %v1056_v63, %v997_v59  ;;  %v999_v7 = vadd.f32 %v2690_v57, %v922_v61  ;;  %v689_v54 = vpop.permute.xlu1 %688 }
 0x11d   : > { %v817_v59 = vsel %vm781_vm3, %v2609_v62, %v689_v54 }
 0x11e   : > { %v1275_v8 = vadd.f32 %v1195_v56, %v1136_v1  ;;  %2198 = vmatmul.msk.bf16.gmra.mxu0 %vm871_vm5, %v838_v50  ;;  %2220 = vmatmul.msk.bf16.gmra.mxu1 %vm871_vm5, %v838_v50 }
 0x120   : > { %vm1307_vm6 = vcmp.ge.f32.partialorder %v1275_v8, 0.0  ;;  %v1343_v9 = vmul.f32 %v2700_v3, %v1275_v8 }
 0x121   : > { %v2714_v12 = vpop.f32.mrf.mxu3 }
 0x122   : > { %v1375_v13 = vsel %vm1307_vm6, %v1275_v8, %v1343_v9 }
 0x123   : > { %1407 = vst.msk [vmem:[%s2710_s23] sm:$0xff] %vm781_vm3, %v1375_v13  ;;  %v924_v14 = vpop.f32.mrf.mxu0  ;;  %v1058_v15 = vpop.f32.mrf.mxu1  ;;  %2244 = vmatmul.msk.bf16.gmra.mxu2 %vm871_vm5, %v842_v11  ;;  %v1439_v22 = vpack.c.bf16 %v1375_v13, %v1375_v13 }
 0x124   : > { %v1137_v5 = vadd.f32 %v1058_v15, %v998_v29  ;;  %v1000_v39 = vadd.f32 %v2690_v57, %v924_v14 }
 0x125   : > { %v1503_v35 = vunpack.c.l.b16 %v1439_v22 }
 0x126   : > { %v1276_v17 = vadd.f32 %v1197_v52, %v1137_v5  ;;  %v1200_v18 = vpop.f32.mrf.mxu2  ;;  %2248 = vmatmul.msk.bf16.gmra.mxu3 %vm871_vm5, %v2637_v31  ;;  %v854_v52 = vsel %vm818_vm4, %v817_v59, %v780_v60  ;;  %vm1736_vm4 = vcmask 1040384  }
 0x128   : > { %vm1308_vm7 = vcmp.ge.f32.partialorder %v1276_v17, 0.0  ;;  %v1344_v19 = vmul.f32 %v2700_v3, %v1276_v17 }
 0x129   : > { %v2723_v16 = vpop.f32.mrf.mxu3 }
 0x12a   : > { %v1376_v24 = vsel %vm1308_vm7, %v1276_v17, %v1344_v19  ;;  %v1023_v59 = vadd.f32 %v2690_v57, %v2723_v16 }
 0x12b   : > { %1408 = vst.msk [vmem:[%s2710_s23 + $0x8] sm:$0xff] %vm781_vm3, %v1376_v24  ;;  %v927_v26 = vpop.f32.mrf.mxu0  ;;  %v1061_v27 = vpop.f32.mrf.mxu1  ;;  %v1440_v21 = vpack.c.bf16 %v1376_v24, %v1376_v24 }
 0x12c   : > { %v1138_v33 = vadd.f32 %v1061_v27, %v999_v7  ;;  %v1001_v51 = vadd.f32 %v2690_v57, %v927_v26 }
 0x12d   : > { %v1504_v36 = vunpack.c.l.b16 %v1440_v21 }
 0x12e   : > { %v1277_v37 = vadd.f32 %v1200_v18, %v1138_v33  ;;  %2199 = vmatmul.msk.bf16.gmra.mxu0 %vm871_vm5, %v840_v30  ;;  %2221 = vmatmul.msk.bf16.gmra.mxu1 %vm871_vm5, %v840_v30  ;;  %v1202_v31 = vpop.f32.mrf.mxu2 }
 0x12f   : > { %v1535_v48 = vpack.c.b16 %v1504_v36, %v1503_v35 }
 0x130   : > { %vm1309_vm8 = vcmp.ge.f32.partialorder %v1277_v37, 0.0  ;;  %v1345_v38 = vmul.f32 %v2700_v3, %v1277_v37 }
 0x131   : > { %1551 = vrot.lane.b32.xlu0 %v1535_v48, %s2306_s24  ;;  %v2732_v34 = vpop.f32.mrf.mxu3 }
 0x132   : > { %v1377_v40 = vsel %vm1309_vm8, %v1277_v37, %v1345_v38  ;;  %vm1960_vm8 = vcmask 27648  }
 0x133   : > { %1409 = vst.msk [vmem:[%s2710_s23 + $0x10] sm:$0xff] %vm781_vm3, %v1377_v40  ;;  %v929_v41 = vpop.f32.mrf.mxu0  ;;  %v1063_v10 = vpop.f32.mrf.mxu1  ;;  %2245 = vmatmul.msk.bf16.gmra.mxu2 %vm871_vm5, %v2581_v42  ;;  %v1441_v46 = vpack.c.bf16 %v1377_v40, %v1377_v40 }
 0x134   : > { %v1139_v0 = vadd.f32 %v1063_v10, %v1000_v39  ;;  %v1002_v63 = vadd.f32 %v2690_v57, %v929_v41 }
 0x135   : > { %v1505_v28 = vunpack.c.l.b16 %v1441_v46 }
 0x136   : > { %v1278_v43 = vadd.f32 %v1202_v31, %v1139_v0  ;;  %v1205_v44 = vpop.f32.mrf.mxu2  ;;  %2249 = vmatmul.msk.bf16.gmra.mxu3 %vm871_vm5, %v2677_v32 }
 0x138   : > { %vm1310_vm9 = vcmp.ge.f32.partialorder %v1278_v43, 0.0  ;;  %v1346_v20 = vmul.f32 %v2700_v3, %v1278_v43 }
 0x139   : > { %v2742_v45 = vpop.f32.mrf.mxu3 }
 0x13a   : > { %v1378_v2 = vsel %vm1310_vm9, %v1278_v43, %v1346_v20 }
 0x13b   : > { %1410 = vst.msk [vmem:[%s2710_s23 + $0x18] sm:$0xff] %vm781_vm3, %v1378_v2  ;;  %v932_v47 = vpop.f32.mrf.mxu0  ;;  %v1066_v23 = vpop.f32.mrf.mxu1  ;;  %v1442_v50 = vpack.c.bf16 %v1378_v2, %v1378_v2 }
 0x13c   : > { %v1140_v53 = vadd.f32 %v1066_v23, %v1001_v51  ;;  %v1003_v14 = vadd.f32 %v2690_v57, %v932_v47 }
 0x13d   : > { %v1506_v25 = vunpack.c.l.b16 %v1442_v50 }
 0x13e   : > { %v1279_v32 = vadd.f32 %v1205_v44, %v1140_v53  ;;  %2200 = vmatmul.msk.bf16.gmra.mxu0 %vm871_vm5, %v842_v11  ;;  %2222 = vmatmul.msk.bf16.gmra.mxu1 %vm871_vm5, %v842_v11  ;;  %v1207_v30 = vpop.f32.mrf.mxu2 }
 0x13f   : > { %v1536_v55 = vpack.c.b16 %v1506_v25, %v1505_v28 }
 0x140   : > { %vm1311_vm10 = vcmp.ge.f32.partialorder %v1279_v32, 0.0  ;;  %v1347_v56 = vmul.f32 %v2700_v3, %v1279_v32 }
 0x141   : > { %1553 = vrot.lane.b32.xlu1 %v1536_v55, %s2306_s24  ;;  %v2753_v61 = vpop.f32.mrf.mxu3 }
 0x142   : > { %v1379_v1 = vsel %vm1311_vm10, %v1279_v32, %v1347_v56  ;;  %vm1963_vm10 = vcmask 24576  }
 0x143   : > { %1411 = vst.msk [vmem:[%s2710_s23 + $0x20] sm:$0xff] %vm781_vm3, %v1379_v1  ;;  %v934_v4 = vpop.f32.mrf.mxu0  ;;  %v1068_v6 = vpop.f32.mrf.mxu1  ;;  %2246 = vmatmul.msk.bf16.gmra.mxu2 %vm871_vm5, %v2601_v58  ;;  %v1443_v13 = vpack.c.bf16 %v1379_v1, %v1379_v1 }
 0x144   : > { %v1141_v8 = vadd.f32 %v1068_v6, %v1002_v63  ;;  %v1004_v33 = vadd.f32 %v2690_v57, %v934_v4 }
 0x145   : > { %v1507_v19 = vunpack.c.l.b16 %v1443_v13 }
 0x146   : > { %v1280_v62 = vadd.f32 %v1207_v30, %v1141_v8  ;;  %v1210_v9 = vpop.f32.mrf.mxu2  ;;  %2250 = vmatmul.msk.bf16.gmra.mxu3 %vm871_vm5, %v854_v52 }
 0x148   : > { %vm1312_vm11 = vcmp.ge.f32.partialorder %v1280_v62, 0.0  ;;  %v1348_v11 = vmul.f32 %v2700_v3, %v1280_v62 }
 0x149   : > { %v2763_v29 = vpop.f32.mrf.mxu3 }
 0x14a   : > { %v1380_v15 = vsel %vm1312_vm11, %v1280_v62, %v1348_v11 }
 0x14b   : > { %1412 = vst.msk [vmem:[%s2710_s23 + $0x28] sm:$0xff] %vm781_vm3, %v1380_v15  ;;  %v937_v5 = vpop.f32.mrf.mxu0  ;;  %v1071_v58 = vpop.f32.mrf.mxu1  ;;  %v1444_v17 = vpack.c.bf16 %v1380_v15, %v1380_v15 }
 0x14c   : > { %v1142_v18 = vadd.f32 %v1071_v58, %v1003_v14  ;;  %v1005_v41 = vadd.f32 %v2690_v57, %v937_v5  ;;  %v1024_v58 = vadd.f32 %v2690_v57, %v2732_v34  ;;  %v1025_v34 = vadd.f32 %v2690_v57, %v2742_v45 }
 0x14d   : > { %v1508_v22 = vunpack.c.l.b16 %v1444_v17 }
 0x14e   : > { %v1281_v7 = vadd.f32 %v1210_v9, %v1142_v18  ;;  %2223 = vmatmul.msk.bf16.gmra.mxu1 %vm871_vm5, %v2581_v42  ;;  %v1212_v24 = vpop.f32.mrf.mxu2  ;;  %vm1737_vm5 = vsmask.f32 256 }
 0x14f   : > { %v1537_v26 = vpack.c.b16 %v1508_v22, %v1507_v19  ;;  %vm2825_vm7 = vmand %vm1736_vm4, %vm1737_vm5 }
 0x150   : > { %vm1313_vm12 = vcmp.ge.f32.partialorder %v1281_v7, 0.0  ;;  %v1349_v27 = vmul.f32 %v2700_v3, %v1281_v7 }
 0x151   : > { %1555 = vrot.lane.b32.xlu2 %v1537_v26, %s2306_s24  ;;  %v2772_v21 = vpop.f32.mrf.mxu3 }
 0x152   : > { %v1381_v35 = vsel %vm1313_vm12, %v1281_v7, %v1349_v27 }
 0x153   : > { %1413 = vst.msk [vmem:[%s2710_s23 + $0x30] sm:$0xff] %vm781_vm3, %v1381_v35  ;;  %v939_v36 = vpop.f32.mrf.mxu0  ;;  %v1073_v37 = vpop.f32.mrf.mxu1  ;;  %v1445_v40 = vpack.c.bf16 %v1381_v35, %v1381_v35 }
 0x154   : > { %v1143_v31 = vadd.f32 %v1073_v37, %v1004_v33  ;;  %v1006_v28 = vadd.f32 %v2690_v57, %v939_v36 }
 0x155   : > { %v1509_v46 = vunpack.c.l.b16 %v1445_v40 }
 0x156   : > { %v1282_v48 = vadd.f32 %v1212_v24, %v1143_v31  ;;  %v1215_v42 = vpop.f32.mrf.mxu2 }
 0x158   : > { %vm1314_vm13 = vcmp.ge.f32.partialorder %v1282_v48, 0.0  ;;  %v1350_v38 = vmul.f32 %v2700_v3, %v1282_v48 }
 0x159   : > { %v2778_v39 = vpop.f32.mrf.mxu3 }
 0x15a   : > { %v1382_v10 = vsel %vm1314_vm13, %v1282_v48, %v1350_v38 }
 0x15b   : > { %1414 = vst.msk [vmem:[%s2710_s23 + $0x38] sm:$0xff] %vm781_vm3, %v1382_v10  ;;  %v942_v0 = vpop.f32.mrf.mxu0  ;;  %v1076_v43 = vpop.f32.mrf.mxu1  ;;  %v1446_v44 = vpack.c.bf16 %v1382_v10, %v1382_v10 }
 0x15c   : > { %v1144_v20 = vadd.f32 %v1076_v43, %v1005_v41  ;;  %v1007_v4 = vadd.f32 %v2690_v57, %v942_v0 }
 0x15d   : > { %v1510_v51 = vunpack.c.l.b16 %v1446_v44 }
 0x15e   : > { %v1283_v2 = vadd.f32 %v1215_v42, %v1144_v20  ;;  %v1217_v47 = vpop.f32.mrf.mxu2 }
 0x15f   : > { %v1538_v23 = vpack.c.b16 %v1510_v51, %v1509_v46 }
 0x160   : > { %vm1315_vm14 = vcmp.ge.f32.partialorder %v1283_v2, 0.0  ;;  %v1351_v50 = vmul.f32 %v2700_v3, %v1283_v2 }
 0x161   : > { %1557 = vrot.lane.b32.xlu0 %v1538_v23, %s2306_s24  ;;  %v2785_v53 = vpop.f32.mrf.mxu3 }
 0x162   : > { %v1383_v25 = vsel %vm1315_vm14, %v1283_v2, %v1351_v50 }
 0x163   : > { %1415 = vst.msk [vmem:[%s2710_s23 + $0x40] sm:$0xff] %vm781_vm3, %v1383_v25  ;;  %v944_v54 = vpop.f32.mrf.mxu0  ;;  %v1078_v32 = vpop.f32.mrf.mxu1  ;;  %v1447_v1 = vpack.c.bf16 %v1383_v25, %v1383_v25 }
 0x164   : > { %v1145_v30 = vadd.f32 %v1078_v32, %v1006_v28  ;;  %v1008_v19 = vadd.f32 %v2690_v57, %v944_v54 }
 0x165   : > { %v1511_v13 = vunpack.c.l.b16 %v1447_v1 }
 0x166   : > { %v1284_v55 = vadd.f32 %v1217_v47, %v1145_v30  ;;  %v1220_v56 = vpop.f32.mrf.mxu2 }
 0x168   : > { %vm1316_vm15 = vcmp.ge.f32.partialorder %v1284_v55, 0.0  ;;  %v1352_v60 = vmul.f32 %v2700_v3, %v1284_v55 }
 0x169   : > { %v1121_v63 = vpop.f32.mrf.mxu3 }
 0x16a   : > { %v1384_v6 = vsel %vm1316_vm15, %v1284_v55, %v1352_v60  ;;  %v2794_v52 = vadd.f32 %v1121_v63, %v1023_v59 }
 0x16b   : > { %1416 = vst.msk [vmem:[%s2710_s23 + $0x48] sm:$0xff] %vm781_vm3, %v1384_v6  ;;  %v947_v8 = vpop.f32.mrf.mxu0  ;;  %v1081_v62 = vpop.f32.mrf.mxu1  ;;  %v1448_v9 = vpack.c.bf16 %v1384_v6, %v1384_v6 }
 0x16c   : > { %v1146_v11 = vadd.f32 %v1081_v62, %v1007_v4  ;;  %v1009_v48 = vadd.f32 %v2690_v57, %v947_v8 }
 0x16d   : > { %v1512_v14 = vunpack.c.l.b16 %v1448_v9 }
 0x16e   : > { %v1285_v16 = vadd.f32 %v1220_v56, %v1146_v11  ;;  %v1222_v15 = vpop.f32.mrf.mxu2  ;;  %v2307_v56 = vmov 0  }
 0x16f   : > { %v1539_v5 = vpack.c.b16 %v1512_v14, %v1511_v13  ;;  %v1586_v59 = vrot.slane %v2307_v56, 7 }
 0x170   : > { %vm1317_vm0 = vcmp.ge.f32.partialorder %v1285_v16, 0.0  ;;  %v1353_v17 = vmul.f32 %v2700_v3, %v1285_v16 }
 0x171   : > { %v1123_v18 = vpop.f32.mrf.mxu3  ;;  %1559 = vrot.lane.b32.xlu1 %v1539_v5, %s2306_s24  ;;  %v1739_v6 = vsel %vm2825_vm7, 0, %v1586_v59  ;;  %v1756_v8 = vsel %vm2825_vm7, %v1586_v59, 0 }
 0x172   : > { %v1385_v22 = vsel %vm1317_vm0, %v1285_v16, %v1353_v17  ;;  %v2803_v7 = vadd.f32 %v1123_v18, %v1024_v58  ;;  %v1807_v13 = vunpack.c.l.b16 %v1739_v6  ;;  %v1808_v14 = vunpack.c.h.b16 %v1739_v6 }
 0x173   : > { %1417 = vst.msk [vmem:[%s2710_s23 + $0x50] sm:$0xff] %vm781_vm3, %v1385_v22  ;;  %v949_v24 = vpop.f32.mrf.mxu0  ;;  %v1083_v26 = vpop.f32.mrf.mxu1  ;;  %v1449_v31 = vpack.c.bf16 %v1385_v22, %v1385_v22  ;;  %v1809_v16 = vunpack.c.l.b16 %v1756_v8 }
 0x174   : > { %v1147_v27 = vadd.f32 %v1083_v26, %v1008_v19  ;;  %v1010_v47 = vadd.f32 %v2690_v57, %v949_v24  ;;  %v1858_v17 = vpack.c.b16 %v1807_v13, %v1807_v13  ;;  %v1859_v18 = vpack.c.b16 %v1808_v14, %v1808_v14 }
 0x175   : > { %v1513_v43 = vunpack.c.l.b16 %v1449_v31  ;;  %v1860_v19 = vpack.c.b16 %v1809_v16, %v1809_v16 }
 0x176   : > { %v1286_v33 = vadd.f32 %v1222_v15, %v1147_v27  ;;  %v1225_v35 = vpop.f32.mrf.mxu2  ;;  %1961 = vst.msk [vmem:[%s2841_s27] sm:$0xf] %vm1960_vm8, %v1858_v17 }
 0x177   : > { %1962 = vst.msk [vmem:[%s2841_s27 + $0x4] sm:$0xf] %vm1960_vm8, %v1859_v18 }
 0x178   : > { %vm1318_vm1 = vcmp.ge.f32.partialorder %v1286_v33, 0.0  ;;  %v1354_v36 = vmul.f32 %v2700_v3, %v1286_v33  ;;  %1964 = vst.msk [vmem:[%s2841_s27 + $0x8] sm:$0x1] %vm1963_vm10, %v1860_v19 }
 0x179   : > { %v1126_v37 = vpop.f32.mrf.mxu3  ;;  %2013 = vst.msk [vmem:[%s2841_s27 + $0xcc] sm:$0xf] %vm1960_vm8, %v1858_v17 }
 0x17a   : > { %v1386_v42 = vsel %vm1318_vm1, %v1286_v33, %v1354_v36  ;;  %v2811_v38 = vadd.f32 %v1126_v37, %v1025_v34  ;;  %2014 = vst.msk [vmem:[%s2841_s27 + $0xd0] sm:$0xf] %vm1960_vm8, %v1859_v18 }
 0x17b   : > { %1418 = vst.msk [vmem:[%s2710_s23 + $0x58] sm:$0xff] %vm781_vm3, %v1386_v42  ;;  %v952_v40 = vpop.f32.mrf.mxu0  ;;  %v1086_v41 = vpop.f32.mrf.mxu1  ;;  %v1450_v10 = vpack.c.bf16 %v1386_v42, %v1386_v42 }
 0x17c   : > { %v1148_v0 = vadd.f32 %v1086_v41, %v1009_v48  ;;  %v1011_v1 = vadd.f32 %v2690_v57, %v952_v40  ;;  %2015 = vst.msk [vmem:[%s2841_s27 + $0xd4] sm:$0x1] %vm1963_vm10, %v1860_v19  ;;  %v1021_v48 = vadd.f32 %v2690_v57, %v2694_v49 }
 0x17d   : > { %v1514_v44 = vunpack.c.l.b16 %v1450_v10 }
 0x17e   : > { %v1287_v45 = vadd.f32 %v1225_v35, %v1148_v0  ;;  %v1227_v20 = vpop.f32.mrf.mxu2  ;;  %v1160_v41 = vadd.f32 %v2778_v39, %v1021_v48 }
 0x17f   : > { %v1540_v46 = vpack.c.b16 %v1514_v44, %v1513_v43 }
 0x180   : > { %vm1319_vm2 = vcmp.ge.f32.partialorder %v1287_v45, 0.0  ;;  %v1355_v51 = vmul.f32 %v2700_v3, %v1287_v45 }
 0x181   : > { %v2816_v2 = vpop.f32.mrf.mxu3  ;;  %1561 = vrot.lane.b32.xlu2 %v1540_v46, %s2306_s24 }
 0x182   : > { %v1387_v23 = vsel %vm1319_vm2, %v1287_v45, %v1355_v51 }
 0x183   : > { %1419 = vst.msk [vmem:[%s2710_s23 + $0x60] sm:$0xff] %vm781_vm3, %v1387_v23  ;;  %v954_v50 = vpop.f32.mrf.mxu0  ;;  %v1088_v28 = vpop.f32.mrf.mxu1  ;;  %v1451_v55 = vpack.c.bf16 %v1387_v23, %v1387_v23 }
 0x184   : > { %v1149_v25 = vadd.f32 %v1088_v28, %v1010_v47  ;;  %v1012_v35 = vadd.f32 %v2690_v57, %v954_v50  ;;  %v1022_v50 = vadd.f32 %v2690_v57, %v2714_v12 }
 0x185   : > { %v1515_v5 = vunpack.c.l.b16 %v1451_v55 }
 0x186   : > { %v1288_v54 = vadd.f32 %v1227_v20, %v1149_v25  ;;  %v1230_v32 = vpop.f32.mrf.mxu2  ;;  %v1161_v55 = vadd.f32 %v2785_v53, %v1022_v50 }
 0x188   : > { %vm1320_vm6 = vcmp.ge.f32.partialorder %v1288_v54, 0.0  ;;  %v1356_v30 = vmul.f32 %v2700_v3, %v1288_v54 }
 0x189   : > { %v2823_v60 = vpop.f32.mrf.mxu3 }
 0x18a   : > { %v1388_v4 = vsel %vm1320_vm6, %v1288_v54, %v1356_v30 }
 0x18b   : > { %1420 = vst.msk [vmem:[%s2710_s23 + $0x68] sm:$0xff] %vm781_vm3, %v1388_v4  ;;  %v957_v62 = vpop.f32.mrf.mxu0  ;;  %v1091_v9 = vpop.f32.mrf.mxu1  ;;  %v1452_v11 = vpack.c.bf16 %v1388_v4, %v1388_v4 }
 0x18c   : > { %v1150_v15 = vadd.f32 %v1091_v9, %v1011_v1  ;;  %v1013_v44 = vadd.f32 %v2690_v57, %v957_v62 }
 0x18d   : > { %v1516_v58 = vunpack.c.l.b16 %v1452_v11 }
 0x18e   : > { %v1289_v22 = vadd.f32 %v1230_v32, %v1150_v15  ;;  %v1232_v24 = vpop.f32.mrf.mxu2 }
 0x18f   : > { %v1541_v26 = vpack.c.b16 %v1516_v58, %v1515_v5 }
 0x190   : > { %vm1321_vm9 = vcmp.ge.f32.partialorder %v1289_v22, 0.0  ;;  %v1357_v27 = vmul.f32 %v2700_v3, %v1289_v22 }
 0x191   : > { %1563 = vrot.lane.b32.xlu0 %v1541_v26, %s2306_s24  ;;  %v2849_v33 = vpop.f32.mrf.mxu3 }
 0x192   : > { %v1389_v34 = vsel %vm1321_vm9, %v1289_v22, %v1357_v27 }
 0x193   : > { %1421 = vst.msk [vmem:[%s2710_s23 + $0x70] sm:$0xff] %vm781_vm3, %v1389_v34  ;;  %v1093_v36 = vpop.f32.mrf.mxu1  ;;  %v959_v37 = vpop.f32.mrf.mxu0  ;;  %v1453_v43 = vpack.c.bf16 %v1389_v34, %v1389_v34 }
 0x194   : > { %v1151_v31 = vadd.f32 %v1093_v36, %v1012_v35  ;;  %v1014_v12 = vadd.f32 %v2690_v57, %v959_v37 }
 0x195   : > { %v1517_v23 = vunpack.c.l.b16 %v1453_v43 }
 0x196   : > { %v1290_v42 = vadd.f32 %v1232_v24, %v1151_v31  ;;  %v1235_v40 = vpop.f32.mrf.mxu2 }
 0x198   : > { %vm1322_vm11 = vcmp.ge.f32.partialorder %v1290_v42, 0.0  ;;  %v1358_v10 = vmul.f32 %v2700_v3, %v1290_v42 }
 0x199   : > { %v1255_v0 = vpop.f32.mrf.mxu3 }
 0x19a   : > { %v1390_v45 = vsel %vm1322_vm11, %v1290_v42, %v1358_v10  ;;  %v1299_v20 = vadd.f32 %v1255_v0, %v1160_v41 }
 0x19b   : > { %1422 = vst.msk [vmem:[%s2710_s23 + $0x78] sm:$0xff] %vm781_vm3, %v1390_v45  ;;  %v1096_v46 = vpop.f32.mrf.mxu1  ;;  %v1454_v51 = vpack.c.bf16 %v1390_v45, %v1390_v45  ;;  %v962_v25 = vpop.f32.mrf.mxu0 }
 0x19c   : > { %vm1331_vm12 = vcmp.ge.f32.partialorder %v1299_v20, 0.0  ;;  %v1367_v49 = vmul.f32 %v2700_v3, %v1299_v20  ;;  %v1152_v47 = vadd.f32 %v1096_v46, %v1013_v44  ;;  %v1015_v22 = vadd.f32 %v2690_v57, %v962_v25 }
 0x19d   : > { %v1518_v39 = vunpack.c.l.b16 %v1454_v51 }
 0x19e   : > { %v1399_v28 = vsel %vm1331_vm12, %v1299_v20, %v1367_v49  ;;  %v1291_v54 = vadd.f32 %v1235_v40, %v1152_v47  ;;  %v1237_v32 = vpop.f32.mrf.mxu2 }
 0x19f   : > { %1431 = vst.msk [vmem:[%s2710_s23 + $0xc0] sm:$0xff] %vm781_vm3, %v1399_v28  ;;  %v1542_v30 = vpack.c.b16 %v1518_v39, %v1517_v23  ;;  %v1463_v11 = vpack.c.bf16 %v1399_v28, %v1399_v28 }
 0x1a0   : > { %vm1323_vm13 = vcmp.ge.f32.partialorder %v1291_v54, 0.0  ;;  %v1359_v56 = vmul.f32 %v2700_v3, %v1291_v54 }
 0x1a1   : > { %1565 = vrot.lane.b32.xlu1 %v1542_v30, %s2306_s24  ;;  %v1257_v59 = vpop.f32.mrf.mxu3  ;;  %v1527_v36 = vunpack.c.l.b16 %v1463_v11 }
 0x1a2   : > { %v1391_v1 = vsel %vm1323_vm13, %v1291_v54, %v1359_v56  ;;  %v1300_v4 = vadd.f32 %v1257_v59, %v1161_v55 }
 0x1a3   : > { %1423 = vst.msk [vmem:[%s2710_s23 + $0x80] sm:$0xff] %vm781_vm3, %v1391_v1  ;;  %v1552_v6 = vpop.permute.xlu0 %1551  ;;  %v1098_v9 = vpop.f32.mrf.mxu1  ;;  %v1455_v44 = vpack.c.bf16 %v1391_v1, %v1391_v1 }
 0x1a4   : > { %vm1332_vm14 = vcmp.ge.f32.partialorder %v1300_v4, 0.0  ;;  %v1368_v8 = vmul.f32 %v2700_v3, %v1300_v4  ;;  %v1591_v62 = vshrl.u32 %v1552_v6, 16  ;;  %v1153_v53 = vadd.f32 %v1098_v9, %v1014_v12  ;;  %v964_v19 = vpop.f32.mrf.mxu0 }
 0x1a5   : > { %v1594_v16 = vshll.u32 %v1552_v6, 16  ;;  %v1519_v54 = vunpack.c.l.b16 %v1455_v44  ;;  %v1016_v59 = vadd.f32 %v2690_v57, %v964_v19 }
 0x1a6   : > { %v1400_v13 = vsel %vm1332_vm14, %v1300_v4, %v1368_v8  ;;  %v1593_v14 = vrot.slane %v1591_v62, 7  ;;  %v1240_v15 = vpop.f32.mrf.mxu2  ;;  %v1292_v58 = vadd.f32 %v1237_v32, %v1153_v53 }
 0x1a7   : > { %1432 = vst.msk [vmem:[%s2710_s23 + $0xc8] sm:$0xff] %vm781_vm3, %v1400_v13  ;;  %v1464_v5 = vpack.c.bf16 %v1400_v13, %v1400_v13 }
 0x1a8   : > { %v1596_v17 = vor.u32 %v1594_v16, %v1593_v14  ;;  %v1757_v18 = vsel %vm2825_vm7, %v1593_v14, 0  ;;  %vm1324_vm15 = vcmp.ge.f32.partialorder %v1292_v58, 0.0  ;;  %v1360_v26 = vmul.f32 %v2700_v3, %v1292_v58 }
 0x1a9   : > { %v1812_v24 = vunpack.c.l.b16 %v1757_v18  ;;  %v1260_v27 = vpop.f32.mrf.mxu3  ;;  %v1528_v37 = vunpack.c.l.b16 %v1464_v5 }
 0x1aa   : > { %v1740_v35 = vsel %vm2825_vm7, 0, %v1596_v17  ;;  %v1301_v34 = vadd.f32 %v1260_v27, %v2794_v52  ;;  %v1392_v40 = vsel %vm1324_vm15, %v1292_v58, %v1360_v26 }
 0x1ab   : > { %v1810_v31 = vunpack.c.l.b16 %v1740_v35  ;;  %v1811_v48 = vunpack.c.h.b16 %v1740_v35  ;;  %v1863_v42 = vpack.c.b16 %v1812_v24, %v1812_v24  ;;  %v1556_v41 = vpop.permute.xlu2 %1555  ;;  %1424 = vst.msk [vmem:[%s2710_s23 + $0x88] sm:$0xff] %vm781_vm3, %v1392_v40  ;;  %v1101_v0 = vpop.f32.mrf.mxu1  ;;  %v1547_v47 = vpack.c.b16 %v1528_v37, %v1527_v36 }
 0x1ac   : > { %vm1333_vm0 = vcmp.ge.f32.partialorder %v1301_v34, 0.0  ;;  %v1369_v10 = vmul.f32 %v2700_v3, %v1301_v34  ;;  %v1605_v43 = vshrl.u32 %v1556_v41, 16  ;;  %v1154_v20 = vadd.f32 %v1101_v0, %v1015_v22  ;;  %v967_v1 = vpop.f32.mrf.mxu0 }
 0x1ad   : > { %v1861_v45 = vpack.c.b16 %v1810_v31, %v1810_v31  ;;  %v1862_v52 = vpack.c.b16 %v1811_v48, %v1811_v48  ;;  %1967 = vst.msk [vmem:[%s2841_s27 + $0x14] sm:$0x1] %vm1963_vm10, %v1863_v42  ;;  %v1608_v46 = vshll.u32 %v1556_v41, 16  ;;  %v1456_v39 = vpack.c.bf16 %v1392_v40, %v1392_v40  ;;  %1575 = vrot.lane.b32.xlu0 %v1547_v47, %s2306_s24 }
 0x1ae   : > { %v1401_v51 = vsel %vm1333_vm0, %v1301_v34, %v1369_v10  ;;  %v1607_v49 = vrot.slane %v1605_v43, 7  ;;  %v1242_v23 = vpop.f32.mrf.mxu2  ;;  %v1293_v50 = vadd.f32 %v1240_v15, %v1154_v20  ;;  %v1017_v26 = vadd.f32 %v2690_v57, %v967_v1 }
 0x1af   : > { %1965 = vst.msk [vmem:[%s2841_s27 + $0xc] sm:$0xf] %vm1960_vm8, %v1861_v45  ;;  %v1520_v32 = vunpack.c.l.b16 %v1456_v39  ;;  %v1465_v58 = vpack.c.bf16 %v1401_v51, %v1401_v51  ;;  %v1026_v39 = vadd.f32 %v2690_v57, %v2753_v61 }
 0x1b0   : > { %1966 = vst.msk [vmem:[%s2841_s27 + $0x10] sm:$0xf] %vm1960_vm8, %v1862_v52  ;;  %v1610_v28 = vor.u32 %v1608_v46, %v1607_v49  ;;  %v1759_v25 = vsel %vm2825_vm7, %v1607_v49, 0  ;;  %vm1325_vm1 = vcmp.ge.f32.partialorder %v1293_v50, 0.0  ;;  %v1361_v30 = vmul.f32 %v2700_v3, %v1293_v50 }
 0x1b1   : > { %1433 = vst.msk [vmem:[%s2710_s23 + $0xd0] sm:$0xff] %vm781_vm3, %v1401_v51  ;;  %v1818_v55 = vunpack.c.l.b16 %v1759_v25  ;;  %v1262_v56 = vpop.f32.mrf.mxu3  ;;  %v1543_v12 = vpack.c.b16 %v1520_v32, %v1519_v54  ;;  %v2930_v10 = vunpack.c.l.b16 %v1465_v58  ;;  %v1165_v32 = vadd.f32 %v2816_v2, %v1026_v39 }
 0x1b2   : > { %v1742_v4 = vsel %vm2825_vm7, 0, %v1610_v28  ;;  %v1302_v6 = vadd.f32 %v1262_v56, %v2803_v7  ;;  %v1393_v8 = vsel %vm1325_vm1, %v1293_v50, %v1361_v30 }
 0x1b3   : > { %v1816_v62 = vunpack.c.l.b16 %v1742_v4  ;;  %v1817_v9 = vunpack.c.h.b16 %v1742_v4  ;;  %v1869_v53 = vpack.c.b16 %v1818_v55, %v1818_v55  ;;  %v1554_v11 = vpop.permute.xlu1 %1553  ;;  %1425 = vst.msk [vmem:[%s2710_s23 + $0x90] sm:$0xff] %vm781_vm3, %v1393_v8  ;;  %1567 = vrot.lane.b32.xlu2 %v1543_v12, %s2306_s24  ;;  %v1103_v16 = vpop.f32.mrf.mxu1  ;;  %v1457_v41 = vpack.c.bf16 %v1393_v8, %v1393_v8 }
 0x1b4   : > { %vm1334_vm2 = vcmp.ge.f32.partialorder %v1302_v6, 0.0  ;;  %v1370_v13 = vmul.f32 %v2700_v3, %v1302_v6  ;;  %v1598_v14 = vshrl.u32 %v1554_v11, 16  ;;  %v1155_v7 = vadd.f32 %v1103_v16, %v1016_v59  ;;  %v969_v52 = vpop.f32.mrf.mxu0 }
 0x1b5   : > { %v1867_v15 = vpack.c.b16 %v1816_v62, %v1816_v62  ;;  %v1868_v5 = vpack.c.b16 %v1817_v9, %v1817_v9  ;;  %1973 = vst.msk [vmem:[%s2841_s27 + $0x2c] sm:$0x1] %vm1963_vm10, %v1869_v53  ;;  %v1601_v19 = vshll.u32 %v1554_v11, 16  ;;  %v1521_v28 = vunpack.c.l.b16 %v1457_v41 }
 0x1b6   : > { %v1402_v17 = vsel %vm1334_vm2, %v1302_v6, %v1370_v13  ;;  %v1600_v18 = vrot.slane %v1598_v14, 7  ;;  %v1294_v24 = vadd.f32 %v1242_v23, %v1155_v7  ;;  %v1245_v34 = vpop.f32.mrf.mxu2  ;;  %v1018_v1 = vadd.f32 %v2690_v57, %v969_v52 }
 0x1b7   : > { %1971 = vst.msk [vmem:[%s2841_s27 + $0x24] sm:$0xf] %vm1960_vm8, %v1867_v15  ;;  %v1466_v22 = vpack.c.bf16 %v1402_v17, %v1402_v17  ;;  %v1027_v62 = vadd.f32 %v2690_v57, %v2763_v29 }
 0x1b8   : > { %1972 = vst.msk [vmem:[%s2841_s27 + $0x28] sm:$0xf] %vm1960_vm8, %v1868_v5  ;;  %v1603_v27 = vor.u32 %v1601_v19, %v1600_v18  ;;  %v1758_v35 = vsel %vm2825_vm7, %v1600_v18, 0  ;;  %vm1326_vm4 = vcmp.ge.f32.partialorder %v1294_v24, 0.0  ;;  %v1362_v37 = vmul.f32 %v2700_v3, %v1294_v24 }
 0x1b9   : > { %1434 = vst.msk [vmem:[%s2710_s23 + $0xd8] sm:$0xff] %vm781_vm3, %v1402_v17  ;;  %v1815_v36 = vunpack.c.l.b16 %v1758_v35  ;;  %v1265_v31 = vpop.f32.mrf.mxu3  ;;  %v2925_v48 = vunpack.c.l.b16 %v1466_v22  ;;  %v1166_v14 = vadd.f32 %v2823_v60, %v1027_v62  ;;  %v1028_v35 = vadd.f32 %v2690_v57, %v2772_v21 }
 0x1ba   : > { %v1741_v42 = vsel %vm2825_vm7, 0, %v1603_v27  ;;  %v1303_v40 = vadd.f32 %v1265_v31, %v2811_v38  ;;  %v1394_v45 = vsel %vm1326_vm4, %v1294_v24, %v1362_v37 }
 0x1bb   : > { %v1813_v0 = vunpack.c.l.b16 %v1741_v42  ;;  %v1814_v43 = vunpack.c.h.b16 %v1741_v42  ;;  %v1866_v44 = vpack.c.b16 %v1815_v36, %v1815_v36  ;;  %1426 = vst.msk [vmem:[%s2710_s23 + $0x98] sm:$0xff] %vm781_vm3, %v1394_v45  ;;  %v1106_v46 = vpop.f32.mrf.mxu1  ;;  %v1458_v51 = vpack.c.bf16 %v1394_v45, %v1394_v45 }
 0x1bc   : > { %vm1335_vm5 = vcmp.ge.f32.partialorder %v1303_v40, 0.0  ;;  %v1371_v20 = vmul.f32 %v2700_v3, %v1303_v40  ;;  %v1156_v47 = vadd.f32 %v1106_v46, %v1017_v26  ;;  %v1548_v23 = vpack.c.b16 %v2925_v48, %v2930_v10  ;;  %v972_v9 = vpop.f32.mrf.mxu0 }
 0x1bd   : > { %v1864_v49 = vpack.c.b16 %v1813_v0, %v1813_v0  ;;  %v1865_v38 = vpack.c.b16 %v1814_v43, %v1814_v43  ;;  %1970 = vst.msk [vmem:[%s2841_s27 + $0x20] sm:$0x1] %vm1963_vm10, %v1866_v44  ;;  %v1522_v25 = vunpack.c.l.b16 %v1458_v51  ;;  %v1019_v17 = vadd.f32 %v2690_v57, %v972_v9 }
 0x1be   : > { %v1403_v50 = vsel %vm1335_vm5, %v1303_v40, %v1371_v20  ;;  %v1295_v54 = vadd.f32 %v1245_v34, %v1156_v47  ;;  %v1247_v61 = vpop.f32.mrf.mxu2  ;;  %v1167_v42 = vadd.f32 %v2849_v33, %v1028_v35 }
 0x1bf   : > { %1968 = vst.msk [vmem:[%s2841_s27 + $0x18] sm:$0xf] %vm1960_vm8, %v1864_v49  ;;  %v1544_v30 = vpack.c.b16 %v1522_v25, %v1521_v28  ;;  %v1467_v6 = vpack.c.bf16 %v1403_v50, %v1403_v50 }
 0x1c0   : > { %1969 = vst.msk [vmem:[%s2841_s27 + $0x1c] sm:$0xf] %vm1960_vm8, %v1865_v38  ;;  %vm1327_vm6 = vcmp.ge.f32.partialorder %v1295_v54, 0.0  ;;  %v1363_v55 = vmul.f32 %v2700_v3, %v1295_v54 }
 0x1c1   : > { %1435 = vst.msk [vmem:[%s2710_s23 + $0xe0] sm:$0xff] %vm781_vm3, %v1403_v50  ;;  %v1267_v56 = vpop.f32.mrf.mxu3  ;;  %1569 = vrot.lane.b32.xlu0 %v1544_v30, %s2306_s24  ;;  %v2960_v5 = vunpack.c.l.b16 %v1467_v6 }
 0x1c2   : > { %v1304_v59 = vadd.f32 %v1267_v56, %v1165_v32  ;;  %v1395_v4 = vsel %vm1327_vm6, %v1295_v54, %v1363_v55 }
 0x1c3   : > { %1427 = vst.msk [vmem:[%s2710_s23 + $0xa0] sm:$0xff] %vm781_vm3, %v1395_v4  ;;  %v1108_v12 = vpop.f32.mrf.mxu1  ;;  %v1459_v29 = vpack.c.bf16 %v1395_v4, %v1395_v4 }
 0x1c4   : > { %vm1336_vm9 = vcmp.ge.f32.partialorder %v1304_v59, 0.0  ;;  %v1372_v2 = vmul.f32 %v2700_v3, %v1304_v59  ;;  %v1157_v8 = vadd.f32 %v1108_v12, %v1018_v1  ;;  %v974_v40 = vpop.f32.mrf.mxu0 }
 0x1c5   : > { %v1523_v36 = vunpack.c.l.b16 %v1459_v29  ;;  %v1020_v21 = vadd.f32 %v2690_v57, %v974_v40 }
 0x1c6   : > { %v1404_v53 = vsel %vm1336_vm9, %v1304_v59, %v1372_v2  ;;  %v1296_v13 = vadd.f32 %v1247_v61, %v1157_v8  ;;  %v1250_v60 = vpop.f32.mrf.mxu2 }
 0x1c7   : > { %1436 = vst.msk [vmem:[%s2710_s23 + $0xe8] sm:$0xff] %vm781_vm3, %v1404_v53  ;;  %v1468_v11 = vpack.c.bf16 %v1404_v53, %v1404_v53 }
 0x1c8   : > { %vm1328_vm11 = vcmp.ge.f32.partialorder %v1296_v13, 0.0  ;;  %v1364_v16 = vmul.f32 %v2700_v3, %v1296_v13 }
 0x1c9   : > { %v1270_v15 = vpop.f32.mrf.mxu3  ;;  %v2962_v7 = vunpack.c.l.b16 %v1468_v11 }
 0x1ca   : > { %v1305_v58 = vadd.f32 %v1270_v15, %v1166_v14  ;;  %v1396_v18 = vsel %vm1328_vm11, %v1296_v13, %v1364_v16 }
 0x1cb   : > { %v1549_v19 = vpack.c.b16 %v2962_v7, %v2960_v5  ;;  %1428 = vst.msk [vmem:[%s2710_s23 + $0xa8] sm:$0xff] %vm781_vm3, %v1396_v18  ;;  %v1111_v24 = vpop.f32.mrf.mxu1  ;;  %v1460_v26 = vpack.c.bf16 %v1396_v18, %v1396_v18 }
 0x1cc   : > { %vm1337_vm12 = vcmp.ge.f32.partialorder %v1305_v58, 0.0  ;;  %v1373_v22 = vmul.f32 %v2700_v3, %v1305_v58  ;;  %v1158_v27 = vadd.f32 %v1111_v24, %v1019_v17 }
 0x1cd   : > { %v1524_v37 = vunpack.c.l.b16 %v1460_v26 }
 0x1ce   : > { %v1405_v34 = vsel %vm1337_vm12, %v1305_v58, %v1373_v22  ;;  %v1297_v31 = vadd.f32 %v1250_v60, %v1158_v27  ;;  %v1252_v38 = vpop.f32.mrf.mxu2 }
 0x1cf   : > { %1437 = vst.msk [vmem:[%s2710_s23 + $0xf0] sm:$0xff] %vm781_vm3, %v1405_v34  ;;  %v1545_v41 = vpack.c.b16 %v1524_v37, %v1523_v36  ;;  %v1469_v49 = vpack.c.bf16 %v1405_v34, %v1405_v34 }
 0x1d0   : > { %vm1329_vm13 = vcmp.ge.f32.partialorder %v1297_v31, 0.0  ;;  %v1365_v0 = vmul.f32 %v2700_v3, %v1297_v31 }
 0x1d1   : > { %v1272_v43 = vpop.f32.mrf.mxu3  ;;  %1571 = vrot.lane.b32.xlu1 %v1545_v41, %s2306_s24  ;;  %v1533_v61 = vunpack.c.l.b16 %v1469_v49 }
 0x1d2   : > { %v1306_v44 = vadd.f32 %v1272_v43, %v1167_v42  ;;  %v1397_v45 = vsel %vm1329_vm13, %v1297_v31, %v1365_v0 }
 0x1d3   : > { %v1558_v52 = vpop.permute.xlu0 %1557  ;;  %1429 = vst.msk [vmem:[%s2710_s23 + $0xb0] sm:$0xff] %vm781_vm3, %v1397_v45  ;;  %v1113_v46 = vpop.f32.mrf.mxu1  ;;  %v1461_v59 = vpack.c.bf16 %v1397_v45, %v1397_v45 }
 0x1d4   : > { %vm1338_vm14 = vcmp.ge.f32.partialorder %v1306_v44, 0.0  ;;  %v1374_v20 = vmul.f32 %v2700_v3, %v1306_v44  ;;  %v1612_v33 = vshrl.u32 %v1558_v52, 16  ;;  %v1159_v51 = vadd.f32 %v1113_v46, %v1020_v21 }
 0x1d5   : > { %v1615_v50 = vshll.u32 %v1558_v52, 16 }
 0x1d6   : > { %v1406_v47 = vsel %vm1338_vm14, %v1306_v44, %v1374_v20  ;;  %v1614_v39 = vrot.slane %v1612_v33, 7  ;;  %v1298_v25 = vadd.f32 %v1252_v38, %v1159_v51 }
 0x1d7   : > { %1438 = vst.msk [vmem:[%s2710_s23 + $0xf8] sm:$0xff] %vm781_vm3, %v1406_v47  ;;  %v1470_v28 = vpack.c.bf16 %v1406_v47, %v1406_v47 }
 0x1d8   : > { %v1617_v57 = vor.u32 %v1615_v50, %v1614_v39  ;;  %v1760_v54 = vsel %vm2825_vm7, %v1614_v39, 0  ;;  %vm1330_vm15 = vcmp.ge.f32.partialorder %v1298_v25, 0.0  ;;  %v1366_v30 = vmul.f32 %v2700_v3, %v1298_v25 }
 0x1d9   : > { %v1821_v32 = vunpack.c.l.b16 %v1760_v54  ;;  %v1534_v55 = vunpack.c.l.b16 %v1470_v28  ;;  %1577 = vrot.lane.b32.xlu1 %v1548_v23, %s2306_s24  ;;  %v1525_v23 = vunpack.c.l.b16 %v1461_v59 }
 0x1da   : > { %v1743_v56 = vsel %vm2825_vm7, 0, %v1617_v57  ;;  %v1398_v12 = vsel %vm1330_vm15, %v1298_v25, %v1366_v30 }
 0x1db   : > { %v1819_v1 = vunpack.c.l.b16 %v1743_v56  ;;  %v1820_v4 = vunpack.c.h.b16 %v1743_v56  ;;  %v1872_v2 = vpack.c.b16 %v1821_v32, %v1821_v32  ;;  %v1562_v6 = vpop.permute.xlu2 %1561  ;;  %1430 = vst.msk [vmem:[%s2710_s23 + $0xb8] sm:$0xff] %vm781_vm3, %v1398_v12  ;;  %v1550_v8 = vpack.c.b16 %v1534_v55, %v1533_v61 }
 0x1dc   : > { %v1626_v3 = vshrl.u32 %v1562_v6, 16  ;;  %v1462_v62 = vpack.c.bf16 %v1398_v12, %v1398_v12  ;;  %v1629_v10 = vshll.u32 %v1562_v6, 16 }
 0x1dd   : > { %v1870_v9 = vpack.c.b16 %v1819_v1, %v1819_v1  ;;  %v1871_v53 = vpack.c.b16 %v1820_v4, %v1820_v4  ;;  %1976 = vst.msk [vmem:[%s2841_s27 + $0x38] sm:$0x1] %vm1963_vm10, %v1872_v2  ;;  %1581 = vrot.lane.b32.xlu0 %v1550_v8, %s2306_s24 }
 0x1de   : > { %v1628_v48 = vrot.slane %v1626_v3, 7  ;;  %v1526_v11 = vunpack.c.l.b16 %v1462_v62 }
 0x1df   : > { %1974 = vst.msk [vmem:[%s2841_s27 + $0x30] sm:$0xf] %vm1960_vm8, %v1870_v9 }
 0x1e0   : > { %1975 = vst.msk [vmem:[%s2841_s27 + $0x34] sm:$0xf] %vm1960_vm8, %v1871_v53  ;;  %v1631_v13 = vor.u32 %v1629_v10, %v1628_v48  ;;  %v1762_v14 = vsel %vm2825_vm7, %v1628_v48, 0  ;;  %v1546_v16 = vpack.c.b16 %v1526_v11, %v1525_v23 }
 0x1e1   : > { %v1827_v15 = vunpack.c.l.b16 %v1762_v14 }
 0x1e2   : > { %v1745_v58 = vsel %vm2825_vm7, 0, %v1631_v13  ;;  %1573 = vrot.lane.b32.xlu2 %v1546_v16, %s2306_s24 }
 0x1e3   : > { %v1825_v29 = vunpack.c.l.b16 %v1745_v58  ;;  %v1826_v17 = vunpack.c.h.b16 %v1745_v58  ;;  %v1878_v18 = vpack.c.b16 %v1827_v15, %v1827_v15  ;;  %v1560_v60 = vpop.permute.xlu1 %1559 }
 0x1e4   : > { %v1619_v22 = vshrl.u32 %v1560_v60, 16  ;;  %v1622_v35 = vshll.u32 %v1560_v60, 16 }
 0x1e5   : > { %v1876_v24 = vpack.c.b16 %v1825_v29, %v1825_v29  ;;  %v1877_v26 = vpack.c.b16 %v1826_v17, %v1826_v17  ;;  %1982 = vst.msk [vmem:[%s2841_s27 + $0x50] sm:$0x1] %vm1963_vm10, %v1878_v18 }
 0x1e6   : > { %v1621_v27 = vrot.slane %v1619_v22, 7 }
 0x1e7   : > { %1980 = vst.msk [vmem:[%s2841_s27 + $0x48] sm:$0xf] %vm1960_vm8, %v1876_v24 }
 0x1e8   : > { %1981 = vst.msk [vmem:[%s2841_s27 + $0x4c] sm:$0xf] %vm1960_vm8, %v1877_v26  ;;  %v1624_v34 = vor.u32 %v1622_v35, %v1621_v27  ;;  %v1761_v36 = vsel %vm2825_vm7, %v1621_v27, 0 }
 0x1e9   : > { %v1824_v37 = vunpack.c.l.b16 %v1761_v36 }
 0x1ea   : > { %v1744_v31 = vsel %vm2825_vm7, 0, %v1624_v34  ;;  %1579 = vrot.lane.b32.xlu2 %v1549_v19, %s2306_s24 }
 0x1eb   : > { %v1822_v42 = vunpack.c.l.b16 %v1744_v31  ;;  %v1823_v40 = vunpack.c.h.b16 %v1744_v31  ;;  %v1875_v41 = vpack.c.b16 %v1824_v37, %v1824_v37 }
 0x1ed   : > { %v1873_v0 = vpack.c.b16 %v1822_v42, %v1822_v42  ;;  %v1874_v43 = vpack.c.b16 %v1823_v40, %v1823_v40  ;;  %1979 = vst.msk [vmem:[%s2841_s27 + $0x44] sm:$0x1] %vm1963_vm10, %v1875_v41 }
 0x1ef   : > { %1977 = vst.msk [vmem:[%s2841_s27 + $0x3c] sm:$0xf] %vm1960_vm8, %v1873_v0 }
 0x1f0   : > { %1978 = vst.msk [vmem:[%s2841_s27 + $0x40] sm:$0xf] %vm1960_vm8, %v1874_v43 }
 0x203   : > { %v1564_v44 = vpop.permute.xlu0 %1563 }
 0x204   : > { %v1633_v21 = vshrl.u32 %v1564_v44, 16  ;;  %v1636_v52 = vshll.u32 %v1564_v44, 16 }
 0x206   : > { %v1635_v45 = vrot.slane %v1633_v21, 7 }
 0x208   : > { %v1638_v5 = vor.u32 %v1636_v52, %v1635_v45  ;;  %v1763_v7 = vsel %vm2825_vm7, %v1635_v45, 0 }
 0x209   : > { %v1830_v19 = vunpack.c.l.b16 %v1763_v7 }
 0x20a   : > { %v1746_v20 = vsel %vm2825_vm7, 0, %v1638_v5 }
 0x20b   : > { %v1828_v33 = vunpack.c.l.b16 %v1746_v20  ;;  %v1829_v46 = vunpack.c.h.b16 %v1746_v20  ;;  %v1881_v51 = vpack.c.b16 %v1830_v19, %v1830_v19 }
 0x20d   : > { %v1879_v49 = vpack.c.b16 %v1828_v33, %v1828_v33  ;;  %v1880_v38 = vpack.c.b16 %v1829_v46, %v1829_v46  ;;  %1985 = vst.msk [vmem:[%s2841_s27 + $0x5c] sm:$0x1] %vm1963_vm10, %v1881_v51  ;;  %v1568_v47 = vpop.permute.xlu2 %1567 }
 0x20e   : > { %v1647_v39 = vshrl.u32 %v1568_v47, 16  ;;  %v1650_v28 = vshll.u32 %v1568_v47, 16 }
 0x20f   : > { %1983 = vst.msk [vmem:[%s2841_s27 + $0x54] sm:$0xf] %vm1960_vm8, %v1879_v49 }
 0x210   : > { %1984 = vst.msk [vmem:[%s2841_s27 + $0x58] sm:$0xf] %vm1960_vm8, %v1880_v38  ;;  %v1649_v50 = vrot.slane %v1647_v39, 7 }
 0x212   : > { %v1652_v25 = vor.u32 %v1650_v28, %v1649_v50  ;;  %v1765_v57 = vsel %vm2825_vm7, %v1649_v50, 0 }
 0x213   : > { %v1566_v54 = vpop.permute.xlu1 %1565  ;;  %v1836_v32 = vunpack.c.l.b16 %v1765_v57 }
 0x214   : > { %v1640_v30 = vshrl.u32 %v1566_v54, 16  ;;  %v1748_v55 = vsel %vm2825_vm7, 0, %v1652_v25  ;;  %v1643_v56 = vshll.u32 %v1566_v54, 16 }
 0x215   : > { %v1834_v61 = vunpack.c.l.b16 %v1748_v55  ;;  %v1835_v59 = vunpack.c.h.b16 %v1748_v55  ;;  %v1887_v1 = vpack.c.b16 %v1836_v32, %v1836_v32 }
 0x216   : > { %v1642_v4 = vrot.slane %v1640_v30, 7 }
 0x217   : > { %v1885_v2 = vpack.c.b16 %v1834_v61, %v1834_v61  ;;  %v1886_v12 = vpack.c.b16 %v1835_v59, %v1835_v59  ;;  %1991 = vst.msk [vmem:[%s2841_s27 + $0x74] sm:$0x1] %vm1963_vm10, %v1887_v1 }
 0x218   : > { %v1645_v6 = vor.u32 %v1643_v56, %v1642_v4  ;;  %v1764_v3 = vsel %vm2825_vm7, %v1642_v4, 0 }
 0x219   : > { %v1833_v8 = vunpack.c.l.b16 %v1764_v3  ;;  %1989 = vst.msk [vmem:[%s2841_s27 + $0x6c] sm:$0xf] %vm1960_vm8, %v1885_v2 }
 0x21a   : > { %v1747_v62 = vsel %vm2825_vm7, 0, %v1645_v6  ;;  %1990 = vst.msk [vmem:[%s2841_s27 + $0x70] sm:$0xf] %vm1960_vm8, %v1886_v12 }
 0x21b   : > { %v1831_v9 = vunpack.c.l.b16 %v1747_v62  ;;  %v1832_v53 = vunpack.c.h.b16 %v1747_v62  ;;  %v1884_v48 = vpack.c.b16 %v1833_v8, %v1833_v8 }
 0x21d   : > { %v1882_v10 = vpack.c.b16 %v1831_v9, %v1831_v9  ;;  %v1883_v23 = vpack.c.b16 %v1832_v53, %v1832_v53  ;;  %1988 = vst.msk [vmem:[%s2841_s27 + $0x68] sm:$0x1] %vm1963_vm10, %v1884_v48 }
 0x21f   : > { %1986 = vst.msk [vmem:[%s2841_s27 + $0x60] sm:$0xf] %vm1960_vm8, %v1882_v10  ;;  %v1576_v11 = vpop.permute.xlu0 %1575 }
 0x220   : > { %1987 = vst.msk [vmem:[%s2841_s27 + $0x64] sm:$0xf] %vm1960_vm8, %v1883_v23  ;;  %v1675_v13 = vshrl.u32 %v1576_v11, 16  ;;  %v1678_v16 = vshll.u32 %v1576_v11, 16 }
 0x222   : > { %v1677_v14 = vrot.slane %v1675_v13, 7 }
 0x224   : > { %v1680_v15 = vor.u32 %v1678_v16, %v1677_v14  ;;  %v1769_v58 = vsel %vm2825_vm7, %v1677_v14, 0 }
 0x225   : > { %v1848_v29 = vunpack.c.l.b16 %v1769_v58 }
 0x226   : > { %v1752_v17 = vsel %vm2825_vm7, 0, %v1680_v15 }
 0x227   : > { %v1846_v18 = vunpack.c.l.b16 %v1752_v17  ;;  %v1847_v60 = vunpack.c.h.b16 %v1752_v17  ;;  %v1899_v22 = vpack.c.b16 %v1848_v29, %v1848_v29 }
 0x229   : > { %v1897_v24 = vpack.c.b16 %v1846_v18, %v1846_v18  ;;  %v1898_v26 = vpack.c.b16 %v1847_v60, %v1847_v60  ;;  %2003 = vst.msk [vmem:[%s2841_s27 + $0xa4] sm:$0x1] %vm1963_vm10, %v1899_v22 }
 0x22b   : > { %2001 = vst.msk [vmem:[%s2841_s27 + $0x9c] sm:$0xf] %vm1960_vm8, %v1897_v24 }
 0x22c   : > { %2002 = vst.msk [vmem:[%s2841_s27 + $0xa0] sm:$0xf] %vm1960_vm8, %v1898_v26 }
 0x233   : > { %v1570_v27 = vpop.permute.xlu0 %1569 }
 0x234   : > { %v1654_v35 = vshrl.u32 %v1570_v27, 16  ;;  %v1657_v36 = vshll.u32 %v1570_v27, 16 }
 0x236   : > { %v1656_v34 = vrot.slane %v1654_v35, 7 }
 0x238   : > { %v1659_v37 = vor.u32 %v1657_v36, %v1656_v34  ;;  %v1766_v31 = vsel %vm2825_vm7, %v1656_v34, 0 }
 0x239   : > { %v1839_v42 = vunpack.c.l.b16 %v1766_v31 }
 0x23a   : > { %v1749_v40 = vsel %vm2825_vm7, 0, %v1659_v37 }
 0x23b   : > { %v1837_v41 = vunpack.c.l.b16 %v1749_v40  ;;  %v1838_v0 = vunpack.c.h.b16 %v1749_v40  ;;  %v1890_v43 = vpack.c.b16 %v1839_v42, %v1839_v42 }
 0x23c   : > { %v1574_v44 = vpop.permute.xlu2 %1573 }
 0x23d   : > { %v1668_v21 = vshrl.u32 %v1574_v44, 16  ;;  %v1888_v45 = vpack.c.b16 %v1837_v41, %v1837_v41  ;;  %v1889_v52 = vpack.c.b16 %v1838_v0, %v1838_v0  ;;  %1994 = vst.msk [vmem:[%s2841_s27 + $0x80] sm:$0x1] %vm1963_vm10, %v1890_v43  ;;  %v1671_v7 = vshll.u32 %v1574_v44, 16 }
 0x23f   : > { %v1670_v5 = vrot.slane %v1668_v21, 7  ;;  %1992 = vst.msk [vmem:[%s2841_s27 + $0x78] sm:$0xf] %vm1960_vm8, %v1888_v45 }
 0x240   : > { %1993 = vst.msk [vmem:[%s2841_s27 + $0x7c] sm:$0xf] %vm1960_vm8, %v1889_v52 }
 0x241   : > { %v1673_v19 = vor.u32 %v1671_v7, %v1670_v5  ;;  %v1768_v20 = vsel %vm2825_vm7, %v1670_v5, 0 }
 0x242   : > { %v1845_v33 = vunpack.c.l.b16 %v1768_v20 }
 0x243   : > { %v1751_v46 = vsel %vm2825_vm7, 0, %v1673_v19  ;;  %v1572_v47 = vpop.permute.xlu1 %1571 }
 0x244   : > { %v1843_v51 = vunpack.c.l.b16 %v1751_v46  ;;  %v1844_v49 = vunpack.c.h.b16 %v1751_v46  ;;  %v1896_v38 = vpack.c.b16 %v1845_v33, %v1845_v33  ;;  %v1580_v39 = vpop.permute.xlu2 %1579  ;;  %v1661_v50 = vshrl.u32 %v1572_v47, 16 }
 0x245   : > { %v1689_v28 = vshrl.u32 %v1580_v39, 16  ;;  %v1664_v32 = vshll.u32 %v1572_v47, 16  ;;  %v1692_v55 = vshll.u32 %v1580_v39, 16 }
 0x246   : > { %v1894_v25 = vpack.c.b16 %v1843_v51, %v1843_v51  ;;  %v1895_v57 = vpack.c.b16 %v1844_v49, %v1844_v49  ;;  %2000 = vst.msk [vmem:[%s2841_s27 + $0x98] sm:$0x1] %vm1963_vm10, %v1896_v38  ;;  %v1663_v54 = vrot.slane %v1661_v50, 7 }
 0x247   : > { %v1691_v30 = vrot.slane %v1689_v28, 7 }
 0x248   : > { %1998 = vst.msk [vmem:[%s2841_s27 + $0x90] sm:$0xf] %vm1960_vm8, %v1894_v25  ;;  %v1666_v56 = vor.u32 %v1664_v32, %v1663_v54  ;;  %v1767_v61 = vsel %vm2825_vm7, %v1663_v54, 0 }
 0x249   : > { %1999 = vst.msk [vmem:[%s2841_s27 + $0x94] sm:$0xf] %vm1960_vm8, %v1895_v57  ;;  %v1694_v59 = vor.u32 %v1692_v55, %v1691_v30  ;;  %v1771_v1 = vsel %vm2825_vm7, %v1691_v30, 0  ;;  %v1842_v4 = vunpack.c.l.b16 %v1767_v61 }
 0x24a   : > { %v1854_v2 = vunpack.c.l.b16 %v1771_v1  ;;  %v1750_v12 = vsel %vm2825_vm7, 0, %v1666_v56 }
 0x24b   : > { %v1754_v6 = vsel %vm2825_vm7, 0, %v1694_v59  ;;  %v1840_v3 = vunpack.c.l.b16 %v1750_v12  ;;  %v1841_v8 = vunpack.c.h.b16 %v1750_v12  ;;  %v1893_v62 = vpack.c.b16 %v1842_v4, %v1842_v4  ;;  %v1578_v53 = vpop.permute.xlu1 %1577 }
 0x24c   : > { %v1852_v9 = vunpack.c.l.b16 %v1754_v6  ;;  %v1853_v48 = vunpack.c.h.b16 %v1754_v6  ;;  %v1905_v10 = vpack.c.b16 %v1854_v2, %v1854_v2  ;;  %v1682_v23 = vshrl.u32 %v1578_v53, 16 }
 0x24d   : > { %v1891_v11 = vpack.c.b16 %v1840_v3, %v1840_v3  ;;  %v1892_v13 = vpack.c.b16 %v1841_v8, %v1841_v8  ;;  %1997 = vst.msk [vmem:[%s2841_s27 + $0x8c] sm:$0x1] %vm1963_vm10, %v1893_v62  ;;  %v1685_v58 = vshll.u32 %v1578_v53, 16 }
 0x24e   : > { %v1903_v14 = vpack.c.b16 %v1852_v9, %v1852_v9  ;;  %v1904_v16 = vpack.c.b16 %v1853_v48, %v1853_v48  ;;  %2009 = vst.msk [vmem:[%s2841_s27 + $0xbc] sm:$0x1] %vm1963_vm10, %v1905_v10  ;;  %v1684_v15 = vrot.slane %v1682_v23, 7 }
 0x24f   : > { %1995 = vst.msk [vmem:[%s2841_s27 + $0x84] sm:$0xf] %vm1960_vm8, %v1891_v11  ;;  %v1582_v29 = vpop.permute.xlu0 %1581 }
 0x250   : > { %1996 = vst.msk [vmem:[%s2841_s27 + $0x88] sm:$0xf] %vm1960_vm8, %v1892_v13  ;;  %v1687_v17 = vor.u32 %v1685_v58, %v1684_v15  ;;  %v1770_v18 = vsel %vm2825_vm7, %v1684_v15, 0  ;;  %v1696_v60 = vshrl.u32 %v1582_v29, 16  ;;  %v1699_v27 = vshll.u32 %v1582_v29, 16 }
 0x251   : > { %2007 = vst.msk [vmem:[%s2841_s27 + $0xb4] sm:$0xf] %vm1960_vm8, %v1903_v14  ;;  %v1851_v22 = vunpack.c.l.b16 %v1770_v18 }
 0x252   : > { %2008 = vst.msk [vmem:[%s2841_s27 + $0xb8] sm:$0xf] %vm1960_vm8, %v1904_v16  ;;  %v1753_v24 = vsel %vm2825_vm7, 0, %v1687_v17  ;;  %v1698_v26 = vrot.slane %v1696_v60, 7 }
 0x253   : > { %v1849_v35 = vunpack.c.l.b16 %v1753_v24  ;;  %v1850_v34 = vunpack.c.h.b16 %v1753_v24  ;;  %v1902_v36 = vpack.c.b16 %v1851_v22, %v1851_v22 }
 0x254   : > { %v1701_v37 = vor.u32 %v1699_v27, %v1698_v26  ;;  %v1772_v31 = vsel %vm2825_vm7, %v1698_v26, 0 }
 0x255   : > { %v1900_v42 = vpack.c.b16 %v1849_v35, %v1849_v35  ;;  %v1901_v40 = vpack.c.b16 %v1850_v34, %v1850_v34  ;;  %2006 = vst.msk [vmem:[%s2841_s27 + $0xb0] sm:$0x1] %vm1963_vm10, %v1902_v36  ;;  %v1857_v41 = vunpack.c.l.b16 %v1772_v31 }
 0x256   : > { %v1755_v0 = vsel %vm2825_vm7, 0, %v1701_v37 }
 0x257   : > { %2004 = vst.msk [vmem:[%s2841_s27 + $0xa8] sm:$0xf] %vm1960_vm8, %v1900_v42  ;;  %v1855_v43 = vunpack.c.l.b16 %v1755_v0  ;;  %v1856_v44 = vunpack.c.h.b16 %v1755_v0  ;;  %v1908_v21 = vpack.c.b16 %v1857_v41, %v1857_v41 }
 0x258   : > { %2005 = vst.msk [vmem:[%s2841_s27 + $0xac] sm:$0xf] %vm1960_vm8, %v1901_v40 }
 0x259   : > { %v1906_v45 = vpack.c.b16 %v1855_v43, %v1855_v43  ;;  %v1907_v52 = vpack.c.b16 %v1856_v44, %v1856_v44  ;;  %2012 = vst.msk [vmem:[%s2841_s27 + $0xc8] sm:$0x1] %vm1963_vm10, %v1908_v21 }
 0x25b   : > { %2010 = vst.msk [vmem:[%s2841_s27 + $0xc0] sm:$0xf] %vm1960_vm8, %v1906_v45 }
 0x25c   : > { %2011 = vst.msk [vmem:[%s2841_s27 + $0xc4] sm:$0xf] %vm1960_vm8, %v1907_v52 }
 0x25d PF: > { %s16_s18 = sadd.s32 1, %s2302_s18  }
 0x25e   : > { %p13_p4 = scmp.ge.s32.totalorder %s16_s18, 4  }
 0x260   :  { %15 = sbr.rel (!%p13_p4) target bundleno = 1 (0x1), region = 80 }

</bundles_post_ra>
